<compile_context>
chip_gen: v6e
topology: v6e:2x2x1
jax: 0.10.0
libtpu: 0.0.40
codegen_flags: <defaults>
</compile_context>

<pallas_src>
import math
import jax
import jax.numpy as jnp
from jax.experimental import pallas as pl
from jax.experimental.pallas import tpu as pltpu

# ---------------- small synthetic BERT config ----------------
B, S = 2, 8            # batch, sequence length
H = 32                 # hidden_size
NH = 4                 # num_attention_heads
HD = H // NH           # head_dim
FF = 64                # intermediate_size
L = 2                  # num_hidden_layers
VOCAB = 128            # (bert-base-chinese has 21128; shrunk for the synthetic kernel)
MAX_POS = 16
TYPE_VOCAB = 2
NUM_CLASSES = 2
LN_EPS = 1e-12
BS = B * S
LANES = 128            # every packed small vector / the output slab padded to 128 lanes
LVEC_ROWS = 8          # per-layer packed vector rows
GVEC_ROWS = 8          # global packed vector rows (4 used, padded to a sublane tile)

# rows of the per-layer packed vector blob, shape (L, LVEC_ROWS, 128)
R_BQKV, R_BO, R_G1, R_B1, R_BI, R_BO2, R_G2, R_B2 = range(8)
# rows of the global packed vector blob, shape (GVEC_ROWS, 128)
R_EMB_G, R_EMB_B, R_POOL_B, R_CLS_B = range(4)


# ---------------- in-kernel helpers ----------------
def _layer_norm(x, gamma, beta, eps=LN_EPS):
    mean = jnp.mean(x, axis=-1, keepdims=True)
    var = jnp.mean(jnp.square(x - mean), axis=-1, keepdims=True)
    return (x - mean) * jax.lax.rsqrt(var + eps) * gamma + beta


def _gelu(x):
    # tanh-approximation GELU: the transcendental lands on the otherwise-idle EUP slot
    # (exact erf GELU would lower to a VALU polynomial).  ~1e-3 delta vs BERT's erf GELU.
    c = math.sqrt(2.0 / math.pi)
    return 0.5 * x * (1.0 + jnp.tanh(c * (x + 0.044715 * (x * x * x))))


def _row(blob, r, n):
    # one packed (1, n) row vector out of a padded (rows, 128) blob
    return blob[r:r + 1, 0:n]


# ---------------- layer-streaming Pallas kernel (grid over encoder layers) ----------------
def bert_fused_kernel(x_ref, mask_ref, wqkv_ref, wo_ref, wi_ref, wo2_ref,
                      lvec_ref, gvec_ref, wp_ref, wc_ref, o_ref, xs_ref):
    l = pl.program_id(0)
    gvec = gvec_ref[...]                           # (GVEC_ROWS, 128) f32 global small vectors

    # embeddings LayerNorm on the first grid step; xs_ref carries activations across layers
    @pl.when(l == 0)
    def _():
        xs_ref[...] = _layer_norm(x_ref[...], _row(gvec, R_EMB_G, H), _row(gvec, R_EMB_B, H))

    x = xs_ref[...]                                # (BS, H) f32
    vec = lvec_ref[0]                              # (LVEC_ROWS, 128) f32 this layer's vectors
    mask = mask_ref[...]                           # (B, 1, S) additive mask, 0 or -10000

    # ---- fused head-major Q/K/V projection: one MXU matmul, 1/sqrt(HD) pre-folded ----
    qkv = jnp.dot(x.astype(jnp.bfloat16), wqkv_ref[0],
                  preferred_element_type=jnp.float32) + _row(vec, R_BQKV, 3 * H)   # (BS, 3H)

    # head split: weights are packed head-major so one contiguous 3*HD lane block per head
    qkv_h = jnp.concatenate(
        [qkv[:, h * 3 * HD:(h + 1) * 3 * HD].reshape(B, S, 3 * HD) for h in range(NH)],
        axis=0)                                    # (NH*B, S, 3*HD), n = h*B + b
    q = qkv_h[..., 0:HD]
    k = qkv_h[..., HD:2 * HD]
    v = qkv_h[..., 2 * HD:3 * HD]

    # ---- batched attention: bf16 operands, f32 accumulation ----
    s = jnp.einsum('nqd,nkd->nqk', q.astype(jnp.bfloat16), k.astype(jnp.bfloat16),
                   preferred_element_type=jnp.float32)                 # (NH*B, S, S)
    s = s.reshape(NH, B, S, S) + mask[None]                            # broadcast mask over heads
    m = jnp.max(s, axis=-1, keepdims=True)
    e = jnp.exp(s - m)
    p = e * pl.reciprocal(jnp.sum(e, axis=-1, keepdims=True), approx=True)
    p = p.reshape(NH * B, S, S)
    ctx = jnp.einsum('nqk,nkd->nqd', p.astype(jnp.bfloat16), v.astype(jnp.bfloat16),
                     preferred_element_type=jnp.float32)               # (NH*B, S, HD)

    # ---- attention output projection: repack heads onto lanes, ONE (BS,H)@(H,H) matmul ----
    ctx_flat = jnp.concatenate(
        [ctx[h * B:(h + 1) * B].reshape(BS, HD) for h in range(NH)], axis=1)       # (BS, H)
    attn = jnp.dot(ctx_flat.astype(jnp.bfloat16), wo_ref[0],
                   preferred_element_type=jnp.float32) + _row(vec, R_BO, H)

    h1 = _layer_norm(x + attn, _row(vec, R_G1, H), _row(vec, R_B1, H))

    # ---- feed-forward ----
    ff = _gelu(jnp.dot(h1.astype(jnp.bfloat16), wi_ref[0],
                       preferred_element_type=jnp.float32) + _row(vec, R_BI, FF))
    ff = jnp.dot(ff.astype(jnp.bfloat16), wo2_ref[0],
                 preferred_element_type=jnp.float32) + _row(vec, R_BO2, H)

    x_out = _layer_norm(h1 + ff, _row(vec, R_G2, H), _row(vec, R_B2, H))
    xs_ref[...] = x_out

    # ---- pooler ([CLS]) + dropout(eval)=identity + classifier on the last grid step ----
    @pl.when(l == pl.num_programs(0) - 1)
    def _():
        cls = x_out.reshape(B, S, H)[:, 0, :]                          # (B, H) [CLS] rows
        pooled = jnp.tanh(jnp.dot(cls.astype(jnp.bfloat16), wp_ref[...],
                                  preferred_element_type=jnp.float32)
                          + _row(gvec, R_POOL_B, H))
        # nn.Dropout(0.3): identity at inference (eval mode)
        o_ref[...] = (jnp.dot(pooled.astype(jnp.bfloat16), wc_ref[...],
                              preferred_element_type=jnp.float32)
                      + gvec[R_CLS_B:R_CLS_B + 1, :])                  # (B, 128) lane-dense


# ---------------- deterministic synthetic parameters ----------------
def init_params(key):
    ks = jax.random.split(key, 12)

    def dense(k, shape):
        return jax.random.normal(k, shape, jnp.float32) * 0.02

    scale = 1.0 / math.sqrt(HD)
    # per-head Q/K/V weights, 1/sqrt(HD) score scale folded into the Q block
    wq = dense(ks[3], (L, NH, H, HD)) * scale
    wk = dense(ks[4], (L, NH, H, HD))
    wv = dense(ks[5], (L, NH, H, HD))
    # head-major fused QKV: columns ordered [h0:(q|k|v) | h1:(q|k|v) | ...]
    wqkv = jnp.concatenate([wq, wk, wv], axis=-1)                      # (L, NH, H, 3*HD)
    wqkv = jnp.transpose(wqkv, (0, 2, 1, 3)).reshape(L, H, 3 * H)      # (L, H, 3H)

    wo = dense(ks[6], (L, H, H))           # rows head-major (h, d) — standard BERT W_o layout
    wi = dense(ks[7], (L, H, FF))
    wo2 = dense(ks[8], (L, FF, H))

    # per-layer packed small vectors: rows = [bqkv, bo, g1, b1, bi, bo2, g2, b2]
    # (bqkv packed head-major to match wqkv columns; q-bias would also carry the folded scale)
    lvec = jnp.zeros((L, LVEC_ROWS, LANES), jnp.float32)
    lvec = lvec.at[:, R_G1, :H].set(1.0).at[:, R_G2, :H].set(1.0)      # fresh-BERT init: biases 0

    # global packed small vectors: rows = [emb_ln_g, emb_ln_b, pooler_b, cls_b]
    gvec = jnp.zeros((GVEC_ROWS, LANES), jnp.float32).at[R_EMB_G, :H].set(1.0)

    # classifier weight padded to 128 output lanes for a lane-dense output store
    cls_w = jnp.zeros((H, LANES), jnp.float32).at[:, :NUM_CLASSES].set(
        dense(ks[9], (H, NUM_CLASSES)))

    return {
        'word_emb': dense(ks[0], (VOCAB, H)),
        'pos_emb': dense(ks[1], (MAX_POS, H)),
        'type_emb': dense(ks[2], (TYPE_VOCAB, H)),
        'wqkv': wqkv.astype(jnp.bfloat16),
        'wo': wo.astype(jnp.bfloat16),
        'wi': wi.astype(jnp.bfloat16),
        'wo2': wo2.astype(jnp.bfloat16),
        'pooler_w': dense(ks[10], (H, H)).astype(jnp.bfloat16),
        'cls_w': cls_w.astype(jnp.bfloat16),
        'layer_vec': lvec,
        'global_vec': gvec,
    }


# ---------------- full forward ----------------
@jax.jit
def bert_fake_news_classifier(params, input_ids, attention_mask, token_type_ids):
    # embeddings (data-dependent gathers stay in plain JAX glue)
    we = jnp.take(params['word_emb'], input_ids, axis=0)               # (B, S, H)
    pe = params['pos_emb'][:S][None, :, :]                             # (1, S, H)
    te = jnp.take(params['type_emb'], token_type_ids, axis=0)          # (B, S, H)
    x = (we + pe + te).astype(jnp.float32).reshape(BS, H)              # (B*S, H)

    # BERT-style extended additive mask, (B, 1, S); broadcast over heads inside the kernel
    mask = (1.0 - attention_mask.astype(jnp.float32))[:, None, :] * -10000.0

    grid_spec = pltpu.PrefetchScalarGridSpec(
        num_scalar_prefetch=0,
        grid=(L,),
        in_specs=[
            pl.BlockSpec((BS, H), lambda l: (0, 0)),                   # activations (layer 0 in)
            pl.BlockSpec((B, 1, S), lambda l: (0, 0, 0)),              # additive mask
            pl.BlockSpec((1, H, 3 * H), lambda l: (l, 0, 0)),          # wqkv  (per-layer stream)
            pl.BlockSpec((1, H, H), lambda l: (l, 0, 0)),              # wo
            pl.BlockSpec((1, H, FF), lambda l: (l, 0, 0)),             # wi
            pl.BlockSpec((1, FF, H), lambda l: (l, 0, 0)),             # wo2
            pl.BlockSpec((1, LVEC_ROWS, LANES), lambda l: (l, 0, 0)),  # per-layer small vectors
            pl.BlockSpec((GVEC_ROWS, LANES), lambda l: (0, 0)),        # global small vectors
            pl.BlockSpec((H, H), lambda l: (0, 0)),                    # pooler weight
            pl.BlockSpec((H, LANES), lambda l: (0, 0)),                # classifier weight (padded)
        ],
        out_specs=pl.BlockSpec((B, LANES), lambda l: (0, 0)),          # lane-dense logits slab
        scratch_shapes=[pltpu.VMEM((BS, H), jnp.float32)],             # activation carry
    )

    logits_pad = pl.pallas_call(
        bert_fused_kernel,
        grid_spec=grid_spec,
        out_shape=jax.ShapeDtypeStruct((B, LANES), jnp.float32),
        compiler_params=pltpu.CompilerParams(dimension_semantics=("arbitrary",)),
        cost_estimate=pl.CostEstimate(flops=580_000, transcendentals=3_200,
                                      bytes_accessed=70_000),
    )(x, mask, params['wqkv'], params['wo'], params['wi'], params['wo2'],
      params['layer_vec'], params['global_vec'],
      params['pooler_w'], params['cls_w'])

    # TODO(synk): for v7x, add a leading "parallel" batch/head grid axis to use both TensorCores.
    return logits_pad[:, :NUM_CLASSES]


if __name__ == "__main__":
    key = jax.random.PRNGKey(0)
    pkey, ikey = jax.random.split(key)
    params = init_params(pkey)

    input_ids = jax.random.randint(ikey, (B, S), 0, VOCAB, dtype=jnp.int32)
    attention_mask = jnp.ones((B, S), jnp.int32).at[1, 6:].set(0)      # pad tail of batch 1
    token_type_ids = jnp.zeros((B, S), jnp.int32).at[:, 4:].set(1)

    logits = bert_fake_news_classifier(params, input_ids, attention_mask, token_type_ids)
    logits = jax.block_until_ready(logits)
    assert logits.shape == (B, NUM_CLASSES) and logits.dtype == jnp.float32
    assert bool(jnp.all(jnp.isfinite(logits)))
    print("KERNEL_OK")
</pallas_src>

<mosaic_0001>
module attributes {stable_mosaic.version = 11 : i64} {
  func.func @bert_fused_kernel(%arg0: i32, %arg1: memref<16x32xf32, #tpu.memory_space<vmem>>, %arg2: memref<2x1x8xf32, #tpu.memory_space<vmem>>, %arg3: memref<1x32x96xbf16, #tpu.memory_space<vmem>>, %arg4: memref<1x32x32xbf16, #tpu.memory_space<vmem>>, %arg5: memref<1x32x64xbf16, #tpu.memory_space<vmem>>, %arg6: memref<1x64x32xbf16, #tpu.memory_space<vmem>>, %arg7: memref<1x8x128xf32, #tpu.memory_space<vmem>>, %arg8: memref<8x128xf32, #tpu.memory_space<vmem>>, %arg9: memref<32x32xbf16, #tpu.memory_space<vmem>>, %arg10: memref<32x128xbf16, #tpu.memory_space<vmem>>, %arg11: memref<2x128xf32, #tpu.memory_space<vmem>>, %arg12: memref<16x32xf32, #tpu.memory_space<vmem>>) attributes {dimension_semantics = [#tpu.dimension_semantics<arbitrary>], iteration_bounds = array<i64: 2>, scalar_prefetch = 0 : i64, scratch_operands = 1 : i64, tpu.core_type = #tpu.core_type<tc>, window_params = [{pipeline_mode = #tpu.pipeline_mode<synchronous>, transform_indices = @transform_0, window_bounds = array<i64: 16, 32>}, {pipeline_mode = #tpu.pipeline_mode<synchronous>, transform_indices = @transform_1, window_bounds = array<i64: 2, 1, 8>}, {transform_indices = @transform_2, window_bounds = array<i64: 1, 32, 96>}, {transform_indices = @transform_3, window_bounds = array<i64: 1, 32, 32>}, {transform_indices = @transform_4, window_bounds = array<i64: 1, 32, 64>}, {transform_indices = @transform_5, window_bounds = array<i64: 1, 64, 32>}, {transform_indices = @transform_6, window_bounds = array<i64: 1, 8, 128>}, {pipeline_mode = #tpu.pipeline_mode<synchronous>, transform_indices = @transform_7, window_bounds = array<i64: 8, 128>}, {pipeline_mode = #tpu.pipeline_mode<synchronous>, transform_indices = @transform_8, window_bounds = array<i64: 32, 32>}, {pipeline_mode = #tpu.pipeline_mode<synchronous>, transform_indices = @transform_9, window_bounds = array<i64: 32, 128>}, {pipeline_mode = #tpu.pipeline_mode<synchronous>, transform_indices = @transform_10, window_bounds = array<i64: 2, 128>}]} {
    %c0 = arith.constant 0 : index
    %c0_0 = arith.constant 0 : index
    %0 = vector.load %arg8[%c0, %c0_0] : memref<8x128xf32, #tpu.memory_space<vmem>>, vector<8x128xf32>
    %c0_i32 = arith.constant 0 : i32
    %1 = arith.cmpi eq, %arg0, %c0_i32 : i32
    %2 = arith.extui %1 : i1 to i32
    %c0_i32_1 = arith.constant 0 : i32
    %3 = arith.cmpi ne, %2, %c0_i32_1 : i32
    scf.if %3 {
      %c0_46 = arith.constant 0 : index
      %c0_47 = arith.constant 0 : index
      %145 = vector.load %arg1[%c0_46, %c0_47] : memref<16x32xf32, #tpu.memory_space<vmem>>, vector<16x32xf32>
      %146 = vector.extract_strided_slice %0 {offsets = [0, 0], sizes = [1, 32], strides = [1, 1]} : vector<8x128xf32> to vector<1x32xf32>
      %147 = vector.extract_strided_slice %0 {offsets = [1, 0], sizes = [1, 32], strides = [1, 1]} : vector<8x128xf32> to vector<1x32xf32>
      %cst_48 = arith.constant dense<0.000000e+00> : vector<16xf32>
      %148 = vector.multi_reduction <add>, %145, %cst_48 [1] : vector<16x32xf32> to vector<16xf32>
      %149 = vector.shape_cast %148 : vector<16xf32> to vector<16x1xf32>
      %cst_49 = arith.constant 3.200000e+01 : f32
      %150 = vector.broadcast %cst_49 : f32 to vector<16x1xf32>
      %151 = arith.divf %149, %150 : vector<16x1xf32>
      %152 = vector.broadcast %151 : vector<16x1xf32> to vector<16x32xf32>
      %153 = arith.subf %145, %152 : vector<16x32xf32>
      %154 = arith.mulf %153, %153 : vector<16x32xf32>
      %cst_50 = arith.constant dense<0.000000e+00> : vector<16xf32>
      %155 = vector.multi_reduction <add>, %154, %cst_50 [1] : vector<16x32xf32> to vector<16xf32>
      %156 = vector.shape_cast %155 : vector<16xf32> to vector<16x1xf32>
      %cst_51 = arith.constant 3.200000e+01 : f32
      %157 = vector.broadcast %cst_51 : f32 to vector<16x1xf32>
      %158 = arith.divf %156, %157 : vector<16x1xf32>
      %159 = vector.broadcast %151 : vector<16x1xf32> to vector<16x32xf32>
      %160 = arith.subf %145, %159 : vector<16x32xf32>
      %cst_52 = arith.constant 9.99999996E-13 : f32
      %161 = vector.broadcast %cst_52 : f32 to vector<16x1xf32>
      %162 = arith.addf %158, %161 : vector<16x1xf32>
      %163 = math.rsqrt %162 : vector<16x1xf32>
      %164 = vector.broadcast %163 : vector<16x1xf32> to vector<16x32xf32>
      %165 = arith.mulf %160, %164 : vector<16x32xf32>
      %166 = vector.broadcast %146 : vector<1x32xf32> to vector<16x32xf32>
      %167 = arith.mulf %165, %166 : vector<16x32xf32>
      %168 = vector.broadcast %147 : vector<1x32xf32> to vector<16x32xf32>
      %169 = arith.addf %167, %168 : vector<16x32xf32>
      %c0_53 = arith.constant 0 : index
      %c0_54 = arith.constant 0 : index
      %170 = vector.load %arg12[%c0_53, %c0_54] : memref<16x32xf32, #tpu.memory_space<vmem>>, vector<16x32xf32>
      tpu.vector_store %arg12[%c0_53, %c0_54], %169 {strides = array<i32>} : memref<16x32xf32, #tpu.memory_space<vmem>>, vector<16x32xf32>,
    } else {
    }
    %c0_2 = arith.constant 0 : index
    %c0_3 = arith.constant 0 : index
    %4 = vector.load %arg12[%c0_2, %c0_3] : memref<16x32xf32, #tpu.memory_space<vmem>>, vector<16x32xf32>
    %c0_4 = arith.constant 0 : index
    %c0_5 = arith.constant 0 : index
    %c0_6 = arith.constant 0 : index
    %5 = vector.load %arg7[%c0_4, %c0_5, %c0_6] : memref<1x8x128xf32, #tpu.memory_space<vmem>>, vector<1x8x128xf32>
    %6 = vector.shape_cast %5 : vector<1x8x128xf32> to vector<8x128xf32>
    %c0_7 = arith.constant 0 : index
    %c0_8 = arith.constant 0 : index
    %c0_9 = arith.constant 0 : index
    %7 = vector.load %arg2[%c0_7, %c0_8, %c0_9] : memref<2x1x8xf32, #tpu.memory_space<vmem>>, vector<2x1x8xf32>
    %8 = arith.truncf %4 : vector<16x32xf32> to vector<16x32xbf16>
    %c0_10 = arith.constant 0 : index
    %c0_11 = arith.constant 0 : index
    %c0_12 = arith.constant 0 : index
    %9 = vector.load %arg3[%c0_10, %c0_11, %c0_12] : memref<1x32x96xbf16, #tpu.memory_space<vmem>>, vector<1x32x96xbf16>
    %10 = vector.shape_cast %9 : vector<1x32x96xbf16> to vector<32x96xbf16>
    %cst = arith.constant dense<0.000000e+00> : vector<16x96xf32>
    %11 = tpu.matmul %8, %10, %cst {dimension_numbers = #tpu.dot_dimension_numbers<[1], [0], [0], [1], [0, 0, 1, 1], [], []>} : vector<16x32xbf16>, vector<32x96xbf16>, vector<16x96xf32> -> vector<16x96xf32>
    %12 = vector.extract_strided_slice %6 {offsets = [0, 0], sizes = [1, 96], strides = [1, 1]} : vector<8x128xf32> to vector<1x96xf32>
    %13 = vector.broadcast %12 : vector<1x96xf32> to vector<16x96xf32>
    %14 = arith.addf %11, %13 : vector<16x96xf32>
    %15 = vector.extract_strided_slice %14 {offsets = [0, 0], sizes = [16, 24], strides = [1, 1]} : vector<16x96xf32> to vector<16x24xf32>
    %16 = vector.shape_cast %15 : vector<16x24xf32> to vector<2x8x24xf32>
    %17 = vector.extract_strided_slice %14 {offsets = [0, 24], sizes = [16, 24], strides = [1, 1]} : vector<16x96xf32> to vector<16x24xf32>
    %18 = vector.shape_cast %17 : vector<16x24xf32> to vector<2x8x24xf32>
    %19 = vector.extract_strided_slice %14 {offsets = [0, 48], sizes = [16, 24], strides = [1, 1]} : vector<16x96xf32> to vector<16x24xf32>
    %20 = vector.shape_cast %19 : vector<16x24xf32> to vector<2x8x24xf32>
    %21 = vector.extract_strided_slice %14 {offsets = [0, 72], sizes = [16, 24], strides = [1, 1]} : vector<16x96xf32> to vector<16x24xf32>
    %22 = vector.shape_cast %21 : vector<16x24xf32> to vector<2x8x24xf32>
    %23 = tpu.concatenate %16, %18, %20, %22 in 0 : vector<2x8x24xf32>, vector<2x8x24xf32>, vector<2x8x24xf32>, vector<2x8x24xf32> -> vector<8x8x24xf32>
    %24 = vector.extract_strided_slice %23 {offsets = [0, 0, 0], sizes = [8, 8, 8], strides = [1, 1, 1]} : vector<8x8x24xf32> to vector<8x8x8xf32>
    %25 = vector.extract_strided_slice %23 {offsets = [0, 0, 8], sizes = [8, 8, 8], strides = [1, 1, 1]} : vector<8x8x24xf32> to vector<8x8x8xf32>
    %26 = vector.extract_strided_slice %23 {offsets = [0, 0, 16], sizes = [8, 8, 8], strides = [1, 1, 1]} : vector<8x8x24xf32> to vector<8x8x8xf32>
    %27 = arith.truncf %24 : vector<8x8x8xf32> to vector<8x8x8xbf16>
    %28 = arith.truncf %25 : vector<8x8x8xf32> to vector<8x8x8xbf16>
    "tpu.trace_start"() <{level = 10 : i32, message = "nqd,nkd->nqk"}> : () -> ()
    %cst_13 = arith.constant dense<0.000000e+00> : vector<8x8x8xf32>
    %29 = tpu.matmul %27, %28, %cst_13 {dimension_numbers = #tpu.dot_dimension_numbers<[2], [2], [1], [1], [0, 0, 0, 1, 1, 1], [0], [0]>} : vector<8x8x8xbf16>, vector<8x8x8xbf16>, vector<8x8x8xf32> -> vector<8x8x8xf32>
    "tpu.trace_stop"() : () -> ()
    %30 = vector.shape_cast %29 : vector<8x8x8xf32> to vector<4x2x8x8xf32>
    %31 = vector.shape_cast %7 : vector<2x1x8xf32> to vector<1x2x1x8xf32>
    %32 = vector.broadcast %31 : vector<1x2x1x8xf32> to vector<4x2x8x8xf32>
    %33 = arith.addf %30, %32 : vector<4x2x8x8xf32>
    %cst_14 = arith.constant dense<0xFF800000> : vector<4x2x8xf32>
    %34 = vector.multi_reduction <maximumf>, %33, %cst_14 [3] : vector<4x2x8x8xf32> to vector<4x2x8xf32>
    %35 = vector.shape_cast %34 : vector<4x2x8xf32> to vector<4x2x8x1xf32>
    %36 = vector.broadcast %35 : vector<4x2x8x1xf32> to vector<4x2x8x8xf32>
    %37 = arith.subf %33, %36 : vector<4x2x8x8xf32>
    %38 = math.exp %37 : vector<4x2x8x8xf32>
    %cst_15 = arith.constant dense<0.000000e+00> : vector<4x2x8xf32>
    %39 = vector.multi_reduction <add>, %38, %cst_15 [3] : vector<4x2x8x8xf32> to vector<4x2x8xf32>
    %40 = vector.shape_cast %39 : vector<4x2x8xf32> to vector<4x2x8x1xf32>
    %41 = tpu.reciprocal %40 {approx = true} : vector<4x2x8x1xf32> -> vector<4x2x8x1xf32>
    %42 = vector.broadcast %41 : vector<4x2x8x1xf32> to vector<4x2x8x8xf32>
    %43 = arith.mulf %38, %42 : vector<4x2x8x8xf32>
    %44 = vector.shape_cast %43 : vector<4x2x8x8xf32> to vector<8x8x8xf32>
    %45 = arith.truncf %44 : vector<8x8x8xf32> to vector<8x8x8xbf16>
    %46 = arith.truncf %26 : vector<8x8x8xf32> to vector<8x8x8xbf16>
    "tpu.trace_start"() <{level = 10 : i32, message = "nqk,nkd->nqd"}> : () -> ()
    %cst_16 = arith.constant dense<0.000000e+00> : vector<8x8x8xf32>
    %47 = tpu.matmul %45, %46, %cst_16 {dimension_numbers = #tpu.dot_dimension_numbers<[2], [1], [1], [2], [0, 0, 0, 1, 1, 2], [0], [0]>} : vector<8x8x8xbf16>, vector<8x8x8xbf16>, vector<8x8x8xf32> -> vector<8x8x8xf32>
    "tpu.trace_stop"() : () -> ()
    %48 = vector.extract_strided_slice %47 {offsets = [0, 0, 0], sizes = [2, 8, 8], strides = [1, 1, 1]} : vector<8x8x8xf32> to vector<2x8x8xf32>
    %49 = vector.shape_cast %48 : vector<2x8x8xf32> to vector<16x8xf32>
    %50 = vector.extract_strided_slice %47 {offsets = [2, 0, 0], sizes = [2, 8, 8], strides = [1, 1, 1]} : vector<8x8x8xf32> to vector<2x8x8xf32>
    %51 = vector.shape_cast %50 : vector<2x8x8xf32> to vector<16x8xf32>
    %52 = vector.extract_strided_slice %47 {offsets = [4, 0, 0], sizes = [2, 8, 8], strides = [1, 1, 1]} : vector<8x8x8xf32> to vector<2x8x8xf32>
    %53 = vector.shape_cast %52 : vector<2x8x8xf32> to vector<16x8xf32>
    %54 = vector.extract_strided_slice %47 {offsets = [6, 0, 0], sizes = [2, 8, 8], strides = [1, 1, 1]} : vector<8x8x8xf32> to vector<2x8x8xf32>
    %55 = vector.shape_cast %54 : vector<2x8x8xf32> to vector<16x8xf32>
    %56 = tpu.concatenate %49, %51, %53, %55 in 1 : vector<16x8xf32>, vector<16x8xf32>, vector<16x8xf32>, vector<16x8xf32> -> vector<16x32xf32>
    %57 = arith.truncf %56 : vector<16x32xf32> to vector<16x32xbf16>
    %c0_17 = arith.constant 0 : index
    %c0_18 = arith.constant 0 : index
    %c0_19 = arith.constant 0 : index
    %58 = vector.load %arg4[%c0_17, %c0_18, %c0_19] : memref<1x32x32xbf16, #tpu.memory_space<vmem>>, vector<1x32x32xbf16>
    %59 = vector.shape_cast %58 : vector<1x32x32xbf16> to vector<32x32xbf16>
    %cst_20 = arith.constant dense<0.000000e+00> : vector<16x32xf32>
    %60 = tpu.matmul %57, %59, %cst_20 {dimension_numbers = #tpu.dot_dimension_numbers<[1], [0], [0], [1], [0, 0, 1, 1], [], []>} : vector<16x32xbf16>, vector<32x32xbf16>, vector<16x32xf32> -> vector<16x32xf32>
    %61 = vector.extract_strided_slice %6 {offsets = [1, 0], sizes = [1, 32], strides = [1, 1]} : vector<8x128xf32> to vector<1x32xf32>
    %62 = vector.broadcast %61 : vector<1x32xf32> to vector<16x32xf32>
    %63 = arith.addf %60, %62 : vector<16x32xf32>
    %64 = arith.addf %4, %63 : vector<16x32xf32>
    %65 = vector.extract_strided_slice %6 {offsets = [2, 0], sizes = [1, 32], strides = [1, 1]} : vector<8x128xf32> to vector<1x32xf32>
    %66 = vector.extract_strided_slice %6 {offsets = [3, 0], sizes = [1, 32], strides = [1, 1]} : vector<8x128xf32> to vector<1x32xf32>
    %cst_21 = arith.constant dense<0.000000e+00> : vector<16xf32>
    %67 = vector.multi_reduction <add>, %64, %cst_21 [1] : vector<16x32xf32> to vector<16xf32>
    %68 = vector.shape_cast %67 : vector<16xf32> to vector<16x1xf32>
    %cst_22 = arith.constant 3.200000e+01 : f32
    %69 = vector.broadcast %cst_22 : f32 to vector<16x1xf32>
    %70 = arith.divf %68, %69 : vector<16x1xf32>
    %71 = vector.broadcast %70 : vector<16x1xf32> to vector<16x32xf32>
    %72 = arith.subf %64, %71 : vector<16x32xf32>
    %73 = arith.mulf %72, %72 : vector<16x32xf32>
    %cst_23 = arith.constant dense<0.000000e+00> : vector<16xf32>
    %74 = vector.multi_reduction <add>, %73, %cst_23 [1] : vector<16x32xf32> to vector<16xf32>
    %75 = vector.shape_cast %74 : vector<16xf32> to vector<16x1xf32>
    %cst_24 = arith.constant 3.200000e+01 : f32
    %76 = vector.broadcast %cst_24 : f32 to vector<16x1xf32>
    %77 = arith.divf %75, %76 : vector<16x1xf32>
    %78 = vector.broadcast %70 : vector<16x1xf32> to vector<16x32xf32>
    %79 = arith.subf %64, %78 : vector<16x32xf32>
    %cst_25 = arith.constant 9.99999996E-13 : f32
    %80 = vector.broadcast %cst_25 : f32 to vector<16x1xf32>
    %81 = arith.addf %77, %80 : vector<16x1xf32>
    %82 = math.rsqrt %81 : vector<16x1xf32>
    %83 = vector.broadcast %82 : vector<16x1xf32> to vector<16x32xf32>
    %84 = arith.mulf %79, %83 : vector<16x32xf32>
    %85 = vector.broadcast %65 : vector<1x32xf32> to vector<16x32xf32>
    %86 = arith.mulf %84, %85 : vector<16x32xf32>
    %87 = vector.broadcast %66 : vector<1x32xf32> to vector<16x32xf32>
    %88 = arith.addf %86, %87 : vector<16x32xf32>
    %89 = arith.truncf %88 : vector<16x32xf32> to vector<16x32xbf16>
    %c0_26 = arith.constant 0 : index
    %c0_27 = arith.constant 0 : index
    %c0_28 = arith.constant 0 : index
    %90 = vector.load %arg5[%c0_26, %c0_27, %c0_28] : memref<1x32x64xbf16, #tpu.memory_space<vmem>>, vector<1x32x64xbf16>
    %91 = vector.shape_cast %90 : vector<1x32x64xbf16> to vector<32x64xbf16>
    %cst_29 = arith.constant dense<0.000000e+00> : vector<16x64xf32>
    %92 = tpu.matmul %89, %91, %cst_29 {dimension_numbers = #tpu.dot_dimension_numbers<[1], [0], [0], [1], [0, 0, 1, 1], [], []>} : vector<16x32xbf16>, vector<32x64xbf16>, vector<16x64xf32> -> vector<16x64xf32>
    %93 = vector.extract_strided_slice %6 {offsets = [4, 0], sizes = [1, 64], strides = [1, 1]} : vector<8x128xf32> to vector<1x64xf32>
    %94 = vector.broadcast %93 : vector<1x64xf32> to vector<16x64xf32>
    %95 = arith.addf %92, %94 : vector<16x64xf32>
    %cst_30 = arith.constant 5.000000e-01 : f32
    %96 = vector.broadcast %cst_30 : f32 to vector<16x64xf32>
    %97 = arith.mulf %96, %95 : vector<16x64xf32>
    %98 = arith.mulf %95, %95 : vector<16x64xf32>
    %99 = arith.mulf %98, %95 : vector<16x64xf32>
    %cst_31 = arith.constant 4.471500e-02 : f32
    %100 = vector.broadcast %cst_31 : f32 to vector<16x64xf32>
    %101 = arith.mulf %100, %99 : vector<16x64xf32>
    %102 = arith.addf %95, %101 : vector<16x64xf32>
    %cst_32 = arith.constant 0.797884583 : f32
    %103 = vector.broadcast %cst_32 : f32 to vector<16x64xf32>
    %104 = arith.mulf %103, %102 : vector<16x64xf32>
    %105 = math.tanh %104 : vector<16x64xf32>
    %cst_33 = arith.constant 1.000000e+00 : f32
    %106 = vector.broadcast %cst_33 : f32 to vector<16x64xf32>
    %107 = arith.addf %106, %105 : vector<16x64xf32>
    %108 = arith.mulf %97, %107 : vector<16x64xf32>
    %109 = arith.truncf %108 : vector<16x64xf32> to vector<16x64xbf16>
    %c0_34 = arith.constant 0 : index
    %c0_35 = arith.constant 0 : index
    %c0_36 = arith.constant 0 : index
    %110 = vector.load %arg6[%c0_34, %c0_35, %c0_36] : memref<1x64x32xbf16, #tpu.memory_space<vmem>>, vector<1x64x32xbf16>
    %111 = vector.shape_cast %110 : vector<1x64x32xbf16> to vector<64x32xbf16>
    %cst_37 = arith.constant dense<0.000000e+00> : vector<16x32xf32>
    %112 = tpu.matmul %109, %111, %cst_37 {dimension_numbers = #tpu.dot_dimension_numbers<[1], [0], [0], [1], [0, 0, 1, 1], [], []>} : vector<16x64xbf16>, vector<64x32xbf16>, vector<16x32xf32> -> vector<16x32xf32>
    %113 = vector.extract_strided_slice %6 {offsets = [5, 0], sizes = [1, 32], strides = [1, 1]} : vector<8x128xf32> to vector<1x32xf32>
    %114 = vector.broadcast %113 : vector<1x32xf32> to vector<16x32xf32>
    %115 = arith.addf %112, %114 : vector<16x32xf32>
    %116 = arith.addf %88, %115 : vector<16x32xf32>
    %117 = vector.extract_strided_slice %6 {offsets = [6, 0], sizes = [1, 32], strides = [1, 1]} : vector<8x128xf32> to vector<1x32xf32>
    %118 = vector.extract_strided_slice %6 {offsets = [7, 0], sizes = [1, 32], strides = [1, 1]} : vector<8x128xf32> to vector<1x32xf32>
    %cst_38 = arith.constant dense<0.000000e+00> : vector<16xf32>
    %119 = vector.multi_reduction <add>, %116, %cst_38 [1] : vector<16x32xf32> to vector<16xf32>
    %120 = vector.shape_cast %119 : vector<16xf32> to vector<16x1xf32>
    %cst_39 = arith.constant 3.200000e+01 : f32
    %121 = vector.broadcast %cst_39 : f32 to vector<16x1xf32>
    %122 = arith.divf %120, %121 : vector<16x1xf32>
    %123 = vector.broadcast %122 : vector<16x1xf32> to vector<16x32xf32>
    %124 = arith.subf %116, %123 : vector<16x32xf32>
    %125 = arith.mulf %124, %124 : vector<16x32xf32>
    %cst_40 = arith.constant dense<0.000000e+00> : vector<16xf32>
    %126 = vector.multi_reduction <add>, %125, %cst_40 [1] : vector<16x32xf32> to vector<16xf32>
    %127 = vector.shape_cast %126 : vector<16xf32> to vector<16x1xf32>
    %cst_41 = arith.constant 3.200000e+01 : f32
    %128 = vector.broadcast %cst_41 : f32 to vector<16x1xf32>
    %129 = arith.divf %127, %128 : vector<16x1xf32>
    %130 = vector.broadcast %122 : vector<16x1xf32> to vector<16x32xf32>
    %131 = arith.subf %116, %130 : vector<16x32xf32>
    %cst_42 = arith.constant 9.99999996E-13 : f32
    %132 = vector.broadcast %cst_42 : f32 to vector<16x1xf32>
    %133 = arith.addf %129, %132 : vector<16x1xf32>
    %134 = math.rsqrt %133 : vector<16x1xf32>
    %135 = vector.broadcast %134 : vector<16x1xf32> to vector<16x32xf32>
    %136 = arith.mulf %131, %135 : vector<16x32xf32>
    %137 = vector.broadcast %117 : vector<1x32xf32> to vector<16x32xf32>
    %138 = arith.mulf %136, %137 : vector<16x32xf32>
    %139 = vector.broadcast %118 : vector<1x32xf32> to vector<16x32xf32>
    %140 = arith.addf %138, %139 : vector<16x32xf32>
    %c0_43 = arith.constant 0 : index
    %c0_44 = arith.constant 0 : index
    %141 = vector.load %arg12[%c0_43, %c0_44] : memref<16x32xf32, #tpu.memory_space<vmem>>, vector<16x32xf32>
    tpu.vector_store %arg12[%c0_43, %c0_44], %140 {strides = array<i32>} : memref<16x32xf32, #tpu.memory_space<vmem>>, vector<16x32xf32>,
    %c1_i32 = arith.constant 1 : i32
    %142 = arith.cmpi eq, %arg0, %c1_i32 : i32
    %143 = arith.extui %142 : i1 to i32
    %c0_i32_45 = arith.constant 0 : i32
    %144 = arith.cmpi ne, %143, %c0_i32_45 : i32
    scf.if %144 {
      %145 = vector.shape_cast %140 : vector<16x32xf32> to vector<2x8x32xf32>
      %146 = vector.extract_strided_slice %145 {offsets = [0, 0, 0], sizes = [2, 1, 32], strides = [1, 1, 1]} : vector<2x8x32xf32> to vector<2x1x32xf32>
      %147 = vector.shape_cast %146 : vector<2x1x32xf32> to vector<2x32xf32>
      %148 = arith.truncf %147 : vector<2x32xf32> to vector<2x32xbf16>
      %c0_46 = arith.constant 0 : index
      %c0_47 = arith.constant 0 : index
      %149 = vector.load %arg9[%c0_46, %c0_47] : memref<32x32xbf16, #tpu.memory_space<vmem>>, vector<32x32xbf16>
      %cst_48 = arith.constant dense<0.000000e+00> : vector<2x32xf32>
      %150 = tpu.matmul %148, %149, %cst_48 {dimension_numbers = #tpu.dot_dimension_numbers<[1], [0], [0], [1], [0, 0, 1, 1], [], []>} : vector<2x32xbf16>, vector<32x32xbf16>, vector<2x32xf32> -> vector<2x32xf32>
      %151 = vector.extract_strided_slice %0 {offsets = [2, 0], sizes = [1, 32], strides = [1, 1]} : vector<8x128xf32> to vector<1x32xf32>
      %152 = vector.broadcast %151 : vector<1x32xf32> to vector<2x32xf32>
      %153 = arith.addf %150, %152 : vector<2x32xf32>
      %154 = math.tanh %153 : vector<2x32xf32>
      %155 = arith.truncf %154 : vector<2x32xf32> to vector<2x32xbf16>
      %c0_49 = arith.constant 0 : index
      %c0_50 = arith.constant 0 : index
      %156 = vector.load %arg10[%c0_49, %c0_50] : memref<32x128xbf16, #tpu.memory_space<vmem>>, vector<32x128xbf16>
      %cst_51 = arith.constant dense<0.000000e+00> : vector<2x128xf32>
      %157 = tpu.matmul %155, %156, %cst_51 {dimension_numbers = #tpu.dot_dimension_numbers<[1], [0], [0], [1], [0, 0, 1, 1], [], []>} : vector<2x32xbf16>, vector<32x128xbf16>, vector<2x128xf32> -> vector<2x128xf32>
      %158 = vector.extract_strided_slice %0 {offsets = [3, 0], sizes = [1, 128], strides = [1, 1]} : vector<8x128xf32> to vector<1x128xf32>
      %159 = vector.broadcast %158 : vector<1x128xf32> to vector<2x128xf32>
      %160 = arith.addf %157, %159 : vector<2x128xf32>
      %c0_52 = arith.constant 0 : index
      %c0_53 = arith.constant 0 : index
      %161 = vector.load %arg11[%c0_52, %c0_53] : memref<2x128xf32, #tpu.memory_space<vmem>>, vector<2x128xf32>
      tpu.vector_store %arg11[%c0_52, %c0_53], %160 {strides = array<i32>} : memref<2x128xf32, #tpu.memory_space<vmem>>, vector<2x128xf32>,
    } else {
    }
    return
  }
  func.func @transform_0(%arg0: i32) -> (i32, i32) {
    %c0_i32 = arith.constant 0 : i32
    %c0_i32_0 = arith.constant 0 : i32
    %c0_i32_1 = arith.constant 0 : i32
    return %c0_i32, %c0_i32_0 : i32, i32
  }
  func.func @transform_1(%arg0: i32) -> (i32, i32, i32) {
    %c0_i32 = arith.constant 0 : i32
    %c0_i32_0 = arith.constant 0 : i32
    %c0_i32_1 = arith.constant 0 : i32
    %c0_i32_2 = arith.constant 0 : i32
    return %c0_i32, %c0_i32_0, %c0_i32_1 : i32, i32, i32
  }
  func.func @transform_2(%arg0: i32) -> (i32, i32, i32) {
    %c0_i32 = arith.constant 0 : i32
    %c0_i32_0 = arith.constant 0 : i32
    %c0_i32_1 = arith.constant 0 : i32
    return %arg0, %c0_i32, %c0_i32_0 : i32, i32, i32
  }
  func.func @transform_3(%arg0: i32) -> (i32, i32, i32) {
    %c0_i32 = arith.constant 0 : i32
    %c0_i32_0 = arith.constant 0 : i32
    %c0_i32_1 = arith.constant 0 : i32
    return %arg0, %c0_i32, %c0_i32_0 : i32, i32, i32
  }
  func.func @transform_4(%arg0: i32) -> (i32, i32, i32) {
    %c0_i32 = arith.constant 0 : i32
    %c0_i32_0 = arith.constant 0 : i32
    %c0_i32_1 = arith.constant 0 : i32
    return %arg0, %c0_i32, %c0_i32_0 : i32, i32, i32
  }
  func.func @transform_5(%arg0: i32) -> (i32, i32, i32) {
    %c0_i32 = arith.constant 0 : i32
    %c0_i32_0 = arith.constant 0 : i32
    %c0_i32_1 = arith.constant 0 : i32
    return %arg0, %c0_i32, %c0_i32_0 : i32, i32, i32
  }
  func.func @transform_6(%arg0: i32) -> (i32, i32, i32) {
    %c0_i32 = arith.constant 0 : i32
    %c0_i32_0 = arith.constant 0 : i32
    %c0_i32_1 = arith.constant 0 : i32
    return %arg0, %c0_i32, %c0_i32_0 : i32, i32, i32
  }
  func.func @transform_7(%arg0: i32) -> (i32, i32) {
    %c0_i32 = arith.constant 0 : i32
    %c0_i32_0 = arith.constant 0 : i32
    %c0_i32_1 = arith.constant 0 : i32
    return %c0_i32, %c0_i32_0 : i32, i32
  }
  func.func @transform_8(%arg0: i32) -> (i32, i32) {
    %c0_i32 = arith.constant 0 : i32
    %c0_i32_0 = arith.constant 0 : i32
    %c0_i32_1 = arith.constant 0 : i32
    return %c0_i32, %c0_i32_0 : i32, i32
  }
  func.func @transform_9(%arg0: i32) -> (i32, i32) {
    %c0_i32 = arith.constant 0 : i32
    %c0_i32_0 = arith.constant 0 : i32
    %c0_i32_1 = arith.constant 0 : i32
    return %c0_i32, %c0_i32_0 : i32, i32
  }
  func.func @transform_10(%arg0: i32) -> (i32, i32) {
    %c0_i32 = arith.constant 0 : i32
    %c0_i32_0 = arith.constant 0 : i32
    %c0_i32_1 = arith.constant 0 : i32
    return %c0_i32, %c0_i32_0 : i32, i32
  }
}

</mosaic_0001>

<bundles_post_ra>
// kernel: bert_fake_news_classifier.1
= control target key start
LH: loop header
LB: loop body
LE: loop exit
PB: predicated region body
PF: predicated region fallthrough
CT: control target
= control target key end

     0   :  { %15 = vsyncpa [#allocation4], 0  ;;  %s2534_s13 = smov 0   ;;  %s2875_s0 = inlined_call_operand.vmem [shape: f32[16,32], index: 0, kind: input, shape index: {}]   ;;  %s2876_s1 = inlined_call_operand.vmem [shape: f32[2,1,8], index: 1, kind: input, shape index: {}]   ;;  %s2877_s2 = inlined_call_operand.vmem [shape: bf16[2,32,96], index: 2, kind: input, shape index: {}]   ;;  %s2878_s3 = inlined_call_operand.vmem [shape: bf16[2,32,32], index: 3, kind: input, shape index: {}]   ;;  %s2879_s4 = inlined_call_operand.vmem [shape: bf16[2,32,64], index: 4, kind: input, shape index: {}]   ;;  %s2880_s5 = inlined_call_operand.vmem [shape: bf16[2,64,32], index: 5, kind: input, shape index: {}]   ;;  %s2881_s6 = inlined_call_operand.vmem [shape: f32[2,8,128], index: 6, kind: input, shape index: {}]   ;;  %s2882_s7 = inlined_call_operand.vmem [shape: f32[8,128], index: 7, kind: input, shape index: {}]   ;;  %s2883_s8 = inlined_call_operand.vmem [shape: bf16[32,32], index: 8, kind: input, shape index: {}]   ;;  %s2884_s9 = inlined_call_operand.vmem [shape: bf16[32,128], index: 9, kind: input, shape index: {}]   ;;  %s2885_s10 = inlined_call_operand.hbm [shape: f32[2,128], index: 10, kind: output, shape index: {}]  }
   0x1 LB: > { %s2540_s14 = sadd.s32 4294967295, %s2464_s13   ;;  %p2051_p0 = scmp.ge.s32.totalorder %s2464_s13, 1  ;;  %s2464_s13 = sphi %s2534_s13, %s21_s13  }
   0x2   : > { %p347_p1 = scmp.lt.s32.totalorder %s2464_s13, 3 }
   0x4   : > { %p348_p2 = pnand %p2051_p0, %p347_p1 }
   0x5   : > { %p399_p3 = scmp.lt.s32.totalorder (!%p348_p2), %s2540_s14, 1  ;;  %p2061_p4 = scmp.ne.s32.totalorder (!%p348_p2), %s2540_s14, 0 }
   0x6   : > { %351 = sbr.rel (%p348_p2) target bundleno = 3356 (0xd1c), region = 60 }
   0xb   : > { %v2548_v0 = vld [vmem:[%s2882_s7] sm:$0xff]  ;;  %s400_s17 = scalar_select %p399_p3, %s2540_s14, 1 }
   0xd   : > { %s2105_s18 = sshll.u32 %s400_s17, 4  ;;  %s2108_s19 = sshll.u32 %s400_s17, 5 }
   0xe   : > { %s2554_s22 = scalar_lea.vmem %s2877_s2, %s2105_s18  ;;  %s2559_s25 = scalar_lea.vmem %s2878_s3, %s2105_s18 }
   0xf   : > { %s2564_s28 = scalar_lea.vmem %s2879_s4, %s2105_s18  ;;  %s2569_s11 = scalar_lea.vmem %s2880_s5, %s2108_s19 }
  0x10   : > { %s2060_s12 = sshll.u32 %s400_s17, 3  ;;  %428 = sbr.rel (%p2061_p4) target bundleno = 335 (0x14f), region = 64 }
  0x11   : > { %s2574_s20 = scalar_lea.vmem %s2881_s6, %s2060_s12 }
  0x15   : > { %v429_v1 = vld [vmem:[%s2875_s0] sm:$0xff]  ;;  %vm431_vm0 = vcmask 261120   ;;  %v430_v2 = vld [vmem:[%s2875_s0 + $0x8] sm:$0xff]  ;;  %v459_v19 = vlaneseq }
  0x16   : > { %v432_v3 = vsel %vm431_vm0, %v429_v1, 0.0  ;;  %v435_v4 = vsel %vm431_vm0, %v430_v2, 0.0 }
  0x17   : > { %433 = vadd.xlane.f32.xlu0 %v432_v3  ;;  %v460_v22 = vshrl.u32 %v459_v19, 7 }
  0x19   : > { %v461_v23 = vsub.s32 0, %v460_v22  ;;  %v467_v24 = vsub.s32 1, %v460_v22 }
  0x1b   : > { %436 = vadd.xlane.f32.xlu0 %v435_v4  ;;  %v462_v25 = vrot.slane %v2548_v0, %v461_v23  ;;  %v468_v27 = vrot.slane %v2548_v0, %v467_v24 }
  0xa0   : > { %v434_v5 = vpop.xlane.xlu0 %433 }
  0xa1   : > { %v439_v6 = vmul.f32 0.03125, %v434_v5 }
  0xa3   : > { %v441_v7 = vsub.f32 %v429_v1, %v439_v6 }
  0xa4   : > { %v437_v8 = vpop.xlane.xlu0 %436 }
  0xa5   : > { %v440_v9 = vmul.f32 0.03125, %v437_v8  ;;  %v443_v10 = vmul.f32 %v441_v7, %v441_v7 }
  0xa7   : > { %v442_v11 = vsub.f32 %v430_v2, %v440_v9  ;;  %v445_v12 = vsel %vm431_vm0, %v443_v10, 0.0 }
  0xa8   : > { %446 = vadd.xlane.f32.xlu1 %v445_v12 }
  0xa9   : > { %v444_v13 = vmul.f32 %v442_v11, %v442_v11 }
  0xab   : > { %v448_v14 = vsel %vm431_vm0, %v444_v13, 0.0 }
  0xac   : > { %449 = vadd.xlane.f32.xlu1 %v448_v14 }
 0x131   : > { %v447_v15 = vpop.xlane.xlu1 %446 }
 0x132   : > { %v451_v16 = vmul.f32 0.03125, %v447_v15 }
 0x134   : > { %v453_v17 = vadd.f32 1e-12, %v451_v16 }
 0x135   : > { %v450_v18 = vpop.xlane.xlu1 %449 }
 0x136   : > { %2336 = vrsqrt.f32 %v453_v17  ;;  %v452_v20 = vmul.f32 0.03125, %v450_v18 }
 0x138   : > { %v454_v21 = vadd.f32 1e-12, %v452_v20 }
 0x13a   : > { %2338 = vrsqrt.f32 %v454_v21 }
 0x143   : > { %v2337_v26 = vpop.eup %2336 }
 0x144   : > { %v457_v28 = vmul.f32 %v2337_v26, %v441_v7 }
 0x146   : > { %v463_v29 = vmul.f32 %v462_v25, %v457_v28 }
 0x147   : > { %v2339_v30 = vpop.eup %2338 }
 0x148   : > { %v469_v31 = vadd.f32 %v468_v27, %v463_v29  ;;  %v458_v32 = vmul.f32 %v2339_v30, %v442_v11 }
 0x14a   : > { %471 = vst.msk [vmem:[#allocation2] sm:$0xff] %vm431_vm0, %v469_v31  ;;  %v464_v33 = vmul.f32 %v462_v25, %v458_v32 }
 0x14c   : > { %v470_v34 = vadd.f32 %v468_v27, %v464_v33 }
 0x14e   : > { %472 = vst.msk [vmem:[#allocation2 + $0x8] sm:$0xff] %vm431_vm0, %v470_v34 }
 0x14f PF: > { %v2370_v35 = vld [vmem:[%s2554_s22 + $0x8] sm:$0xff]   ;;  %v2466_v36 = vmov 0.0   ;;  %v2371_v37 = vld [vmem:[%s2554_s22] sm:$0xff]   ;;  %vm2467_vm1 = vmmov 0   ;;  %vm499_vm2 = vcmask 261120   ;;  %v483_v41 = vlaneseq  ;;  %s2468_s17 = smov 56  }
 0x150   : > { %2161 = vmatprep.subr.bf16.mxu0 %v2466_v36  ;;  %2169 = vmatprep.subr.bf16.mxu1 %v2466_v36  ;;  %v2614_v44 = vld [vmem:[%s2574_s20] sm:$0xff]  ;;  %s2469_s19 = smov 104   ;;  %s2470_s22 = smov 120   ;;  %vm575_vm3 = vcmask 64512   ;;  %vm1086_vm4 = vcmask 1043456   ;;  %vm1492_vm5 = vcmask 130048  }
 0x151   : > { %2162 = vmatpush3.bf16.msra.mxu0 %v2370_v35  ;;  %2165 = vmatprep.mubr.msk.bf16.mxu0 %vm2467_vm1, %v2466_v36  ;;  %v2597_v38 = vld [vmem:[#allocation2] sm:$0xff]  ;;  %v2610_v42 = vshrl.u32 %v483_v41, 7  ;;  %s2471_s26 = smov 80   ;;  %s2472_s27 = smov 112   ;;  %vm1495_vm6 = vcmask 195584   ;;  %vm1724_vm7 = vcmask 523264  }
 0x152   : > { %2163 = vmatprep.subr.bf16.mxu0 %v2466_v36  ;;  %2171 = vmatprep.mubr.msk.bf16.mxu1 %vm2467_vm1, %v2466_v36  ;;  %v2073_v27 = vld [vmem:[%s2876_s1] ss:$0 sm:$0xff]  ;;  %v2074_v31 = vld [vmem:[%s2876_s1 + $0x1] ss:$0 sm:$0xff]  ;;  %s2473_s16 = smov 8   ;;  %s2474_s20 = smov 16  }
 0x153   : > { %v485_v43 = vsub.s32 0, %v2610_v42  ;;  %s2475_s21 = smov 24   ;;  %p2094_p5 = scmp.ne.s32.totalorder %s2540_s14, 1 }
 0x155   : > { %v2599_v39 = vld [vmem:[#allocation2 + $0x8] sm:$0xff]  ;;  %2164 = vmatpush3.bf16.msra.mxu0 %v2371_v37  ;;  %v486_v46 = vrot.slane %v2614_v44, %v485_v43 }
 0x156   : > { %v478_v40 = vpack.c.bf16 %v2599_v39, %v2597_v38  ;;  %2175 = vmatprep.subr.bf16.mxu0 %v2466_v36 }
 0x158   : > { %2166 = vmatmul.mubr.msk.bf16.vlgmr.msra.gmra.mxu0 %vm499_vm2, %v478_v40 }
 0x159   : > { %2177 = vmatprep.mubr.msk.bf16.mxu0 %vm2467_vm1, %v2466_v36 }
 0x218   : > { %v537_v45 = vpop.f32.mrf.mxu0 }
 0x219   : > { %v538_v49 = vadd.f32 %v537_v45, %v486_v46 }
 0x21a   : > { %v2167_v47 = vpop.f32.mrf.mxu0 }
 0x21b   : > { %v564_v53 = vpack.c.bf16 %v538_v49, %v538_v49 }
 0x21c   : > { %v540_v48 = vpop.f32.mrf.mxu0 }
 0x21d   : > { %v541_v50 = vadd.f32 %v540_v48, %v486_v46 }
 0x21e   : > { %v2168_v51 = vpop.f32.mrf.mxu0 }
 0x21f   : > { %v2350_v52 = vpack.i.bf16 %v541_v50, %v538_v49  ;;  %v565_v54 = vpack.c.bf16 %v541_v50, %v541_v50 }
 0x221   : > { %2351 = vrot.lane.b32.xlu1 %v2350_v52, %s2468_s17  ;;  %2341 = vrot.lane.b32.xlu0 %v2350_v52, %s2469_s19 }
 0x225   : > { %573 = vrot.lane.b32.xlu1 %v564_v53, %s2470_s22  ;;  %2346 = vrot.lane.b32.xlu0 %v2350_v52, %s2471_s26 }
 0x229   : > { %623 = vrot.lane.b32.xlu0 %v565_v54, %s2470_s22 }
 0x293   : > { %v2352_v55 = vpop.permute.xlu1 %2351  ;;  %v2342_v56 = vpop.permute.xlu0 %2341 }
 0x294   : > { %v2344_v57 = vunpack.i.h.bf16 %v2342_v56  ;;  %v2343_v58 = vunpack.i.l.bf16 %v2342_v56  ;;  %v2353_v3 = vunpack.i.l.bf16 %v2352_v55  ;;  %v2354_v6 = vunpack.i.h.bf16 %v2352_v55 }
 0x296   : > { %v2619_v59 = vpack.c.bf16 %v2344_v57, %v2344_v57  ;;  %v2621_v60 = vpack.c.bf16 %v2343_v58, %v2343_v58  ;;  %v2638_v9 = vpack.c.bf16 %v2353_v3, %v2353_v3  ;;  %v2641_v10 = vpack.c.bf16 %v2354_v6, %v2354_v6 }
 0x297   : > { %v574_v61 = vpop.permute.xlu1 %573  ;;  %v2347_v62 = vpop.permute.xlu0 %2346 }
 0x298   : > { %v2349_v63 = vunpack.i.h.bf16 %v2347_v62  ;;  %v2348_v1 = vunpack.i.l.bf16 %v2347_v62  ;;  %672 = vrot.lane.b32.xlu1 %v2621_v60, %s2470_s22  ;;  %721 = vrot.lane.b32.xlu0 %v2619_v59, %s2470_s22  ;;  %v580_v2 = vsel %vm575_vm3, %v574_v61, 0 }
 0x299   : > { %2170 = vmatpush3.bf16.xpose.msra.mxu1 %v580_v2 }
 0x29a   : > { %v2628_v4 = vpack.c.bf16 %v2349_v63, %v2349_v63  ;;  %v2630_v5 = vpack.c.bf16 %v2348_v1, %v2348_v1  ;;  %2181 = vmatprep.subr.bf16.mxu1 %v2466_v36 }
 0x29b   : > { %v624_v7 = vpop.permute.xlu0 %623 }
 0x29c   : > { %v629_v8 = vsel %vm575_vm3, %v624_v7, 0  ;;  %770 = vrot.lane.b32.xlu1 %v2630_v5, %s2470_s22  ;;  %819 = vrot.lane.b32.xlu0 %v2628_v4, %s2470_s22 }
 0x29d   : > { %2176 = vmatpush3.bf16.xpose.msra.mxu0 %v629_v8 }
 0x29e   : > { %2187 = vmatprep.subr.bf16.mxu0 %v2466_v36 }
 0x2a0   : > { %2172 = vmatmul.mubr.msk.bf16.vlgmr.msra.gmra.mxu1 %vm575_vm3, %v564_v53  ;;  %868 = vrot.lane.b32.xlu1 %v2638_v9, %s2470_s22 }
 0x2a1   : > { %917 = vrot.lane.b32.xlu0 %v2641_v10, %s2470_s22  ;;  %2183 = vmatprep.mubr.msk.bf16.mxu1 %vm2467_vm1, %v2466_v36 }
 0x2a4   : > { %1130 = vrot.lane.b32.xlu1 %v565_v54, %s2472_s27  ;;  %2178 = vmatmul.mubr.msk.bf16.vlgmr.msra.gmra.mxu0 %vm575_vm3, %v565_v54 }
 0x2a5   : > { %1081 = vrot.lane.b32.xlu0 %v564_v53, %s2472_s27  ;;  %2189 = vmatprep.mubr.msk.bf16.mxu0 %vm2467_vm1, %v2466_v36 }
 0x30a   : > { %v673_v11 = vpop.permute.xlu1 %672  ;;  %v722_v12 = vpop.permute.xlu0 %721 }
 0x30b   : > { %v678_v13 = vsel %vm575_vm3, %v673_v11, 0  ;;  %v727_v14 = vsel %vm575_vm3, %v722_v12, 0 }
 0x30c   : > { %2182 = vmatpush3.bf16.xpose.msra.mxu1 %v678_v13  ;;  %2188 = vmatpush3.bf16.xpose.msra.mxu0 %v727_v14 }
 0x30d   : > { %2193 = vmatprep.subr.bf16.mxu1 %v2466_v36  ;;  %2199 = vmatprep.subr.bf16.mxu0 %v2466_v36 }
 0x30e   : > { %v771_v15 = vpop.permute.xlu1 %770  ;;  %v820_v16 = vpop.permute.xlu0 %819 }
 0x30f   : > { %v776_v17 = vsel %vm575_vm3, %v771_v15, 0  ;;  %v825_v18 = vsel %vm575_vm3, %v820_v16, 0 }
 0x312   : > { %v869_v19 = vpop.permute.xlu1 %868 }
 0x313   : > { %2184 = vmatmul.mubr.msk.bf16.vlgmr.msra.gmra.mxu1 %vm575_vm3, %v2621_v60  ;;  %2190 = vmatmul.mubr.msk.bf16.vlgmr.msra.gmra.mxu0 %vm575_vm3, %v2619_v59  ;;  %v918_v20 = vpop.permute.xlu0 %917  ;;  %v874_v21 = vsel %vm575_vm3, %v869_v19, 0 }
 0x314   : > { %2194 = vmatpush3.bf16.xpose.msra.mxu1 %v776_v17  ;;  %2200 = vmatpush3.bf16.xpose.msra.mxu0 %v825_v18  ;;  %v923_v22 = vsel %vm575_vm3, %v918_v20, 0 }
 0x315   : > { %2195 = vmatprep.mubr.msk.bf16.mxu1 %vm2467_vm1, %v2466_v36  ;;  %2201 = vmatprep.mubr.msk.bf16.mxu0 %vm2467_vm1, %v2466_v36 }
 0x316   : > { %2205 = vmatprep.subr.bf16.mxu1 %v2466_v36  ;;  %2211 = vmatprep.subr.bf16.mxu0 %v2466_v36  ;;  %v1131_v23 = vpop.permute.xlu1 %1130 }
 0x317   : > { %v1082_v24 = vpop.permute.xlu0 %1081  ;;  %v1136_v25 = vsel %vm1086_vm4, %v1131_v23, 0 }
 0x318   : > { %v1088_v26 = vsel %vm1086_vm4, %v1082_v24, 0 }
 0x31b   : > { %2196 = vmatmul.mubr.msk.bf16.vlgmr.msra.gmra.mxu1 %vm575_vm3, %v2630_v5  ;;  %2202 = vmatmul.mubr.msk.bf16.vlgmr.msra.gmra.mxu0 %vm575_vm3, %v2628_v4 }
 0x31c   : > { %2206 = vmatpush3.bf16.xpose.msra.mxu1 %v874_v21  ;;  %2212 = vmatpush3.bf16.xpose.msra.mxu0 %v923_v22 }
 0x31d   : > { %2207 = vmatprep.mubr.msk.bf16.mxu1 %vm2467_vm1, %v2466_v36  ;;  %2213 = vmatprep.mubr.msk.bf16.mxu0 %vm2467_vm1, %v2466_v36 }
 0x31e   : > { %2217 = vmatprep.subr.bf16.mxu1 %v2466_v36  ;;  %2223 = vmatprep.subr.bf16.mxu0 %v2466_v36 }
 0x323   : > { %2208 = vmatmul.mubr.msk.bf16.vlgmr.msra.gmra.mxu1 %vm575_vm3, %v2638_v9  ;;  %2214 = vmatmul.mubr.msk.bf16.vlgmr.msra.gmra.mxu0 %vm575_vm3, %v2641_v10 }
 0x324   : > { %2218 = vmatpush3.bf16.msra.mxu1 %v1088_v26  ;;  %2224 = vmatpush3.bf16.msra.mxu0 %v1136_v25 }
 0x325   : > { %2219 = vmatprep.mubr.msk.bf16.mxu1 %vm2467_vm1, %v2466_v36  ;;  %2225 = vmatprep.mubr.msk.bf16.mxu0 %vm2467_vm1, %v2466_v36 }
 0x326   : > { %2229 = vmatprep.subr.bf16.mxu1 %v2466_v36  ;;  %2235 = vmatprep.subr.bf16.mxu0 %v2466_v36 }
 0x360   : > { %v616_v28 = vpop.f32.mrf.mxu1 }
 0x361   : > { %v977_v29 = vadd.f32 %v2073_v27, %v616_v28 }
 0x362   : > { %v2173_v30 = vpop.f32.mrf.mxu1 }
 0x363   : > { %v985_v32 = vsel %vm575_vm3, %v977_v29, -inf }
 0x364   : > { %v619_v33 = vpop.f32.mrf.mxu1  ;;  %986 = vmax.xlane.f32.xlu1 %v985_v32  ;;  %v665_v34 = vpop.f32.mrf.mxu0 }
 0x365   : > { %v978_v35 = vadd.f32 %v2074_v31, %v665_v34 }
 0x366   : > { %v2174_v37 = vpop.f32.mrf.mxu1  ;;  %v2179_v40 = vpop.f32.mrf.mxu0 }
 0x367   : > { %v988_v41 = vsel %vm575_vm3, %v978_v35, -inf }
 0x368   : > { %989 = vmax.xlane.f32.xlu0 %v988_v41  ;;  %v668_v43 = vpop.f32.mrf.mxu0 }
 0x36a   : > { %v2180_v45 = vpop.f32.mrf.mxu0 }
 0x3d3   : > { %v714_v46 = vpop.f32.mrf.mxu1  ;;  %v763_v47 = vpop.f32.mrf.mxu0 }
 0x3d4   : > { %v979_v48 = vadd.f32 %v2073_v27, %v714_v46  ;;  %v980_v49 = vadd.f32 %v2074_v31, %v763_v47 }
 0x3d5   : > { %v2185_v50 = vpop.f32.mrf.mxu1  ;;  %v2191_v51 = vpop.f32.mrf.mxu0 }
 0x3d6   : > { %v991_v52 = vsel %vm575_vm3, %v979_v48, -inf  ;;  %v994_v53 = vsel %vm575_vm3, %v980_v49, -inf }
 0x3d7   : > { %v717_v54 = vpop.f32.mrf.mxu1  ;;  %992 = vmax.xlane.f32.xlu0 %v991_v52  ;;  %995 = vmax.xlane.f32.xlu1 %v994_v53  ;;  %v766_v55 = vpop.f32.mrf.mxu0 }
 0x3d9   : > { %v2186_v56 = vpop.f32.mrf.mxu1  ;;  %v2192_v57 = vpop.f32.mrf.mxu0 }
 0x3db   : > { %v812_v58 = vpop.f32.mrf.mxu1  ;;  %v861_v61 = vpop.f32.mrf.mxu0 }
 0x3dc   : > { %v2705_v62 = vadd.f32 %v2073_v27, %v812_v58  ;;  %v982_v63 = vadd.f32 %v2074_v31, %v861_v61 }
 0x3dd   : > { %v2197_v1 = vpop.f32.mrf.mxu1  ;;  %v2203_v2 = vpop.f32.mrf.mxu0 }
 0x3de   : > { %v997_v3 = vsel %vm575_vm3, %v2705_v62, -inf  ;;  %v1000_v6 = vsel %vm575_vm3, %v982_v63, -inf }
 0x3df   : > { %v815_v7 = vpop.f32.mrf.mxu1  ;;  %998 = vmax.xlane.f32.xlu0 %v997_v3  ;;  %1001 = vmax.xlane.f32.xlu1 %v1000_v6  ;;  %v864_v8 = vpop.f32.mrf.mxu0 }
 0x3e1   : > { %v2198_v11 = vpop.f32.mrf.mxu1  ;;  %v2204_v12 = vpop.f32.mrf.mxu0 }
 0x3e3   : > { %v910_v13 = vpop.f32.mrf.mxu1  ;;  %v959_v14 = vpop.f32.mrf.mxu0 }
 0x3e4   : > { %v2710_v15 = vadd.f32 %v2073_v27, %v910_v13  ;;  %v984_v16 = vadd.f32 %v2074_v31, %v959_v14 }
 0x3e5   : > { %v2209_v17 = vpop.f32.mrf.mxu1  ;;  %v2215_v18 = vpop.f32.mrf.mxu0 }
 0x3e6   : > { %v1003_v19 = vsel %vm575_vm3, %v2710_v15, -inf  ;;  %v1006_v20 = vsel %vm575_vm3, %v984_v16, -inf }
 0x3e7   : > { %v913_v21 = vpop.f32.mrf.mxu1  ;;  %1004 = vmax.xlane.f32.xlu0 %v1003_v19  ;;  %1007 = vmax.xlane.f32.xlu1 %v1006_v20  ;;  %v962_v22 = vpop.f32.mrf.mxu0 }
 0x3e9   : > { %v2210_v23 = vpop.f32.mrf.mxu1  ;;  %v2216_v24 = vpop.f32.mrf.mxu0 }
 0x3ed   : > { %v987_v25 = vpop.xlane.xlu1 %986 }
 0x3ee   : > { %v1009_v27 = vsub.f32 %v977_v29, %v987_v25 }
 0x3f0   : > { %v1017_v30 = vmul.f32 1.442695, %v1009_v27 }
 0x3f1   : > { %v990_v26 = vpop.xlane.xlu0 %989 }
 0x3f2   : > { %v1010_v28 = vsub.f32 %v978_v35, %v990_v26  ;;  %2380 = vpow2.f32 %v1017_v30 }
 0x3f4   : > { %v1019_v31 = vmul.f32 1.442695, %v1010_v28 }
 0x3f6   : > { %2382 = vpow2.f32 %v1019_v31 }
 0x3f8   : > { %1178 = vrot.lane.b32.xlu1 %v2621_v60, %s2472_s27 }
 0x3fd   : > { %1226 = vrot.lane.b32.xlu0 %v2619_v59, %s2472_s27 }
 0x3ff   : > { %v2381_v32 = vpop.eup %2380 }
 0x400   : > { %v1033_v34 = vsel %vm575_vm3, %v2381_v32, 0.0 }
 0x403   : > { %v2383_v33 = vpop.eup %2382 }
 0x404   : > { %v1036_v37 = vsel %vm575_vm3, %v2383_v33, 0.0 }
 0x41c   : > { %1034 = vadd.xlane.f32.xlu0 %v1033_v34  ;;  %1037 = vadd.xlane.f32.xlu1 %v1036_v37 }
 0x42d   : > { %1274 = vrot.lane.b32.xlu1 %v2630_v5, %s2472_s27 }
 0x460   : > { %v993_v59 = vpop.xlane.xlu0 %992  ;;  %v996_v60 = vpop.xlane.xlu1 %995 }
 0x461   : > { %v1011_v40 = vsub.f32 %v979_v48, %v993_v59  ;;  %v1012_v29 = vsub.f32 %v980_v49, %v996_v60 }
 0x463   : > { %v1021_v35 = vmul.f32 1.442695, %v1011_v40  ;;  %v1023_v41 = vmul.f32 1.442695, %v1012_v29 }
 0x465   : > { %2384 = vpow2.f32 %v1021_v35 }
 0x466   : > { %2386 = vpow2.f32 %v1023_v41 }
 0x468   : > { %v1002_v43 = vpop.xlane.xlu1 %1001  ;;  %v999_v57 = vpop.xlane.xlu0 %998 }
 0x469   : > { %v1014_v45 = vsub.f32 %v982_v63, %v1002_v43  ;;  %v1013_v58 = vsub.f32 %v2705_v62, %v999_v57 }
 0x46b   : > { %v1027_v46 = vmul.f32 1.442695, %v1014_v45  ;;  %v1025_v63 = vmul.f32 1.442695, %v1013_v58 }
 0x46d   : > { %2388 = vpow2.f32 %v1027_v46 }
 0x470   : > { %v1008_v47 = vpop.xlane.xlu1 %1007  ;;  %v1005_v61 = vpop.xlane.xlu0 %1004 }
 0x471   : > { %v1016_v50 = vsub.f32 %v984_v16, %v1008_v47  ;;  %v1015_v1 = vsub.f32 %v2710_v15, %v1005_v61 }
 0x472   : > { %v2385_v51 = vpop.eup %2384 }
 0x473   : > { %v2387_v52 = vpop.eup %2386  ;;  %v1031_v53 = vmul.f32 1.442695, %v1016_v50  ;;  %v1039_v54 = vsel %vm575_vm3, %v2385_v51, 0.0  ;;  %v1029_v2 = vmul.f32 1.442695, %v1015_v1 }
 0x474   : > { %1040 = vadd.xlane.f32.xlu0 %v1039_v54  ;;  %v1042_v5 = vsel %vm575_vm3, %v2387_v52, 0.0  ;;  %v1227_v3 = vpop.permute.xlu0 %1226  ;;  %v1179_v6 = vpop.permute.xlu1 %1178 }
 0x475   : > { %1043 = vadd.xlane.f32.xlu1 %v1042_v5  ;;  %2390 = vpow2.f32 %v1031_v53  ;;  %v1184_v18 = vsel %vm1086_vm4, %v1179_v6, 0  ;;  %v1232_v19 = vsel %vm1086_vm4, %v1227_v3, 0 }
 0x476   : > { %2392 = vpow2.f32 %v1025_v63 }
 0x477   : > { %2394 = vpow2.f32 %v1029_v2 }
 0x47a   : > { %v2725_v48 = vpop.eup %2388 }
 0x47b   : > { %v1048_v49 = vsel %vm575_vm3, %v2725_v48, 0.0 }
 0x47c   : > { %1049 = vadd.xlane.f32.xlu1 %v1048_v49 }
 0x482   : > { %v2729_v55 = vpop.eup %2390 }
 0x483   : > { %v1054_v56 = vsel %vm575_vm3, %v2729_v55, 0.0  ;;  %v2739_v7 = vpop.eup %2392 }
 0x484   : > { %1055 = vadd.xlane.f32.xlu1 %v1054_v56  ;;  %v2743_v62 = vpop.eup %2394 }
 0x48a   : > { %1322 = vrot.lane.b32.xlu0 %v2628_v4, %s2472_s27  ;;  %v1045_v4 = vsel %vm575_vm3, %v2739_v7, 0.0 }
 0x495   : > { %1370 = vrot.lane.b32.xlu1 %v2638_v9, %s2472_s27  ;;  %v1051_v9 = vsel %vm575_vm3, %v2743_v62, 0.0 }
 0x4a5   : > { %v1035_v8 = vpop.xlane.xlu0 %1034  ;;  %v1038_v11 = vpop.xlane.xlu1 %1037 }
 0x4a6   : > { %2396 = vrcp.f32 %v1035_v8 }
 0x4a7   : > { %2398 = vrcp.f32 %v1038_v11 }
 0x4a9   : > { %1046 = vadd.xlane.f32.xlu0 %v1045_v4  ;;  %v1275_v20 = vpop.permute.xlu1 %1274 }
 0x4ad   : > { %1052 = vadd.xlane.f32.xlu0 %v1051_v9 }
 0x4b3   : > { %v2397_v12 = vpop.eup %2396 }
 0x4b4   : > { %v2399_v13 = vpop.eup %2398  ;;  %v1065_v14 = vmul.f32 %v2397_v12, %v2381_v32  ;;  %v1280_v32 = vsel %vm1086_vm4, %v1275_v20, 0 }
 0x4b5   : > { %v1066_v15 = vmul.f32 %v2399_v13, %v2383_v33 }
 0x4b6   : > { %v1073_v16 = vpack.c.bf16 %v1065_v14, %v1065_v14 }
 0x4b7   : > { %v1074_v17 = vpack.c.bf16 %v1066_v15, %v1066_v15  ;;  %v2372_v15 = vld [vmem:[%s2559_s25 + $0x8] sm:$0xff]  }
 0x4b8   : > { %2220 = vmatmul.mubr.msk.bf16.vlgmr.msra.gmra.mxu1 %vm575_vm3, %v1073_v16 }
 0x4b9   : > { %2226 = vmatmul.mubr.msk.bf16.vlgmr.msra.gmra.mxu0 %vm575_vm3, %v1074_v17  ;;  %2230 = vmatpush3.bf16.msra.mxu1 %v1184_v18 }
 0x4ba   : > { %2236 = vmatpush3.bf16.msra.mxu0 %v1232_v19  ;;  %2231 = vmatprep.mubr.msk.bf16.mxu1 %vm2467_vm1, %v2466_v36 }
 0x4bb   : > { %2237 = vmatprep.mubr.msk.bf16.mxu0 %vm2467_vm1, %v2466_v36  ;;  %2241 = vmatprep.subr.bf16.mxu1 %v2466_v36 }
 0x4bc   : > { %2247 = vmatprep.subr.bf16.mxu0 %v2466_v36 }
 0x4c3   : > { %1418 = vrot.lane.b32.xlu0 %v2641_v10, %s2472_s27 }
 0x4fd   : > { %v1041_v21 = vpop.xlane.xlu0 %1040 }
 0x4fe   : > { %2400 = vrcp.f32 %v1041_v21  ;;  %v1044_v22 = vpop.xlane.xlu1 %1043  ;;  %v2373_v21 = vld [vmem:[%s2559_s25] sm:$0xff]  }
 0x4ff   : > { %2402 = vrcp.f32 %v1044_v22 }
 0x501   : > { %v1323_v28 = vpop.permute.xlu0 %1322 }
 0x502   : > { %v1328_v10 = vsel %vm1086_vm4, %v1323_v28, 0 }
 0x505   : > { %v1050_v23 = vpop.xlane.xlu1 %1049 }
 0x506   : > { %2404 = vrcp.f32 %v1050_v23 }
 0x50b   : > { %v2401_v24 = vpop.eup %2400 }
 0x50c   : > { %v2403_v25 = vpop.eup %2402  ;;  %v1067_v26 = vmul.f32 %v2401_v24, %v2385_v51 }
 0x50d   : > { %v1068_v27 = vmul.f32 %v2403_v25, %v2387_v52  ;;  %v1056_v59 = vpop.xlane.xlu1 %1055 }
 0x50e   : > { %v1075_v30 = vpack.c.bf16 %v1067_v26, %v1067_v26  ;;  %2406 = vrcp.f32 %v1056_v59 }
 0x50f   : > { %v1076_v31 = vpack.c.bf16 %v1068_v27, %v1068_v27 }
 0x510   : > { %2232 = vmatmul.mubr.msk.bf16.vlgmr.msra.gmra.mxu1 %vm575_vm3, %v1075_v30 }
 0x511   : > { %2238 = vmatmul.mubr.msk.bf16.vlgmr.msra.gmra.mxu0 %vm575_vm3, %v1076_v31  ;;  %2242 = vmatpush3.bf16.msra.mxu1 %v1280_v32  ;;  %v1371_v50 = vpop.permute.xlu1 %1370 }
 0x512   : > { %2248 = vmatpush3.bf16.msra.mxu0 %v1328_v10  ;;  %2249 = vmatprep.mubr.msk.bf16.mxu0 %vm2467_vm1, %v2466_v36  ;;  %v1376_v53 = vsel %vm1086_vm4, %v1371_v50, 0 }
 0x513   : > { %2259 = vmatprep.subr.bf16.mxu0 %v2466_v36  ;;  %2243 = vmatprep.mubr.msk.bf16.mxu1 %vm2467_vm1, %v2466_v36  ;;  %v2405_v33 = vpop.eup %2404 }
 0x514   : > { %2253 = vmatprep.subr.bf16.mxu1 %v2466_v36  ;;  %v1070_v34 = vmul.f32 %v2405_v33, %v2725_v48 }
 0x516   : > { %v1078_v37 = vpack.c.bf16 %v1070_v34, %v1070_v34 }
 0x519   : > { %2250 = vmatmul.mubr.msk.bf16.vlgmr.msra.gmra.mxu0 %vm575_vm3, %v1078_v37 }
 0x51a   : > { %2261 = vmatprep.mubr.msk.bf16.mxu0 %vm2467_vm1, %v2466_v36 }
 0x51b   : > { %v2407_v40 = vpop.eup %2406 }
 0x51c   : > { %v1072_v35 = vmul.f32 %v2407_v40, %v2729_v55 }
 0x51e   : > { %v1080_v45 = vpack.c.bf16 %v1072_v35, %v1072_v35 }
 0x532   : > { %v1047_v60 = vpop.xlane.xlu0 %1046 }
 0x533   : > { %2408 = vrcp.f32 %v1047_v60 }
 0x536   : > { %v1053_v29 = vpop.xlane.xlu0 %1052 }
 0x537   : > { %2410 = vrcp.f32 %v1053_v29 }
 0x53a   : > { %v1419_v41 = vpop.permute.xlu0 %1418 }
 0x53b   : > { %v1424_v43 = vsel %vm1086_vm4, %v1419_v41, 0 }
 0x53c   : > { %2260 = vmatpush3.bf16.msra.mxu0 %v1424_v43 }
 0x53d   : > { %2273 = vmatprep.subr.bf16.mxu0 %v2466_v36 }
 0x53f   : > { %2262 = vmatmul.mubr.msk.bf16.vlgmr.msra.gmra.mxu0 %vm575_vm3, %v1080_v45 }
 0x540   : > { %v2409_v46 = vpop.eup %2408  ;;  %2277 = vmatprep.mubr.msk.bf16.mxu0 %vm2467_vm1, %v2466_v36 }
 0x541   : > { %v1069_v47 = vmul.f32 %v2409_v46, %v2739_v7 }
 0x543   : > { %v1077_v51 = vpack.c.bf16 %v1069_v47, %v1069_v47 }
 0x544   : > { %v2411_v52 = vpop.eup %2410 }
 0x545   : > { %2244 = vmatmul.mubr.msk.bf16.vlgmr.msra.gmra.mxu1 %vm575_vm3, %v1077_v51  ;;  %v1071_v54 = vmul.f32 %v2411_v52, %v2743_v62  ;;  %v1505_v51 = vsub.s32 1, %v2610_v42 }
 0x546   : > { %2254 = vmatpush3.bf16.msra.mxu1 %v1376_v53  ;;  %2255 = vmatprep.mubr.msk.bf16.mxu1 %vm2467_vm1, %v2466_v36 }
 0x547   : > { %2265 = vmatprep.subr.bf16.mxu1 %v2466_v36  ;;  %v1079_v5 = vpack.c.bf16 %v1071_v54, %v1071_v54  ;;  %v1506_v52 = vrot.slane %v2614_v44, %v1505_v51 }
 0x54d   : > { %2256 = vmatmul.mubr.msk.bf16.vlgmr.msra.gmra.mxu1 %vm575_vm3, %v1079_v5 }
 0x54e   : > { %2269 = vmatprep.mubr.msk.bf16.mxu1 %vm2467_vm1, %v2466_v36  ;;  %2266 = vmatpush3.bf16.msra.mxu1 %v2372_v15 }
 0x54f   : > { %2267 = vmatprep.subr.bf16.mxu1 %v2466_v36 }
 0x552   : > { %2268 = vmatpush3.bf16.msra.mxu1 %v2373_v21  ;;  %v1600_v21 = vsub.s32 3, %v2610_v42 }
 0x553   : > { %2281 = vmatprep.subr.bf16.mxu1 %v2466_v36 }
 0x578   : > { %v1124_v48 = vpop.f32.mrf.mxu1 }
 0x579   : > { %v1172_v49 = vpop.f32.mrf.mxu0 }
 0x57a   : > { %v2221_v55 = vpop.f32.mrf.mxu1 }
 0x57b   : > { %v2227_v56 = vpop.f32.mrf.mxu0 }
 0x57c   : > { %v1127_v57 = vpop.f32.mrf.mxu1 }
 0x57d   : > { %v1175_v58 = vpop.f32.mrf.mxu0 }
 0x57e   : > { %v2222_v61 = vpop.f32.mrf.mxu1 }
 0x57f   : > { %v2228_v63 = vpop.f32.mrf.mxu0 }
 0x5d0   : > { %v1220_v1 = vpop.f32.mrf.mxu1 }
 0x5d1   : > { %v1268_v2 = vpop.f32.mrf.mxu0 }
 0x5d2   : > { %v2355_v3 = vpack.i.bf16 %v1268_v2, %v1220_v1  ;;  %v2233_v6 = vpop.f32.mrf.mxu1 }
 0x5d3   : > { %v2239_v7 = vpop.f32.mrf.mxu0 }
 0x5d4   : > { %2356 = vrot.lane.b32.xlu1 %v2355_v3, %s2473_s16  ;;  %v1223_v8 = vpop.f32.mrf.mxu1 }
 0x5d5   : > { %v1271_v11 = vpop.f32.mrf.mxu0 }
 0x5d6   : > { %v2234_v4 = vpop.f32.mrf.mxu1 }
 0x5d7   : > { %v2240_v62 = vpop.f32.mrf.mxu0 }
 0x5d8   : > { %v2374_v62 = vld [vmem:[%s2564_s28 + $0x8] sm:$0xff]  }
 0x5d9   : > { %v1364_v9 = vpop.f32.mrf.mxu0  ;;  %2274 = vmatpush3.bf16.msra.mxu0 %v2374_v62 }
 0x5da   : > { %2275 = vmatprep.subr.bf16.mxu0 %v2466_v36 }
 0x5db   : > { %v2251_v12 = vpop.f32.mrf.mxu0 }
 0x5dd   : > { %v1367_v13 = vpop.f32.mrf.mxu0 }
 0x5df   : > { %v2252_v14 = vpop.f32.mrf.mxu0 }
 0x5ff   : > { %v1460_v16 = vpop.f32.mrf.mxu0 }
 0x601   : > { %v2263_v17 = vpop.f32.mrf.mxu0 }
 0x602   : > { %v1594_v17 = vsub.s32 2, %v2610_v42 }
 0x603   : > { %v1463_v18 = vpop.f32.mrf.mxu0 }
 0x605   : > { %v1316_v19 = vpop.f32.mrf.mxu1  ;;  %v2264_v20 = vpop.f32.mrf.mxu0 }
 0x606   : > { %v2360_v22 = vpack.i.bf16 %v1364_v9, %v1316_v19  ;;  %v1595_v20 = vrot.slane %v2614_v44, %v1594_v17 }
 0x607   : > { %v2245_v23 = vpop.f32.mrf.mxu1 }
 0x608   : > { %2361 = vrot.lane.b32.xlu0 %v2360_v22, %s2474_s20 }
 0x609   : > { %v1319_v24 = vpop.f32.mrf.mxu1 }
 0x60b   : > { %v2246_v25 = vpop.f32.mrf.mxu1 }
 0x60c   : > { %v1601_v25 = vrot.slane %v2614_v44, %v1600_v21 }
 0x60d   : > { %v1412_v26 = vpop.f32.mrf.mxu1 }
 0x60e   : > { %v2365_v27 = vpack.i.bf16 %v1460_v16, %v1412_v26 }
 0x60f   : > { %v2257_v28 = vpop.f32.mrf.mxu1 }
 0x610   : > { %2366 = vrot.lane.b32.xlu1 %v2365_v27, %s2475_s21 }
 0x611   : > { %v1415_v30 = vpop.f32.mrf.mxu1 }
 0x613   : > { %v2258_v31 = vpop.f32.mrf.mxu1 }
 0x614   : > { %v2376_v31 = vld [vmem:[%s2569_s11 + $0x18] sm:$0xff]  }
 0x646   : > { %v2357_v32 = vpop.permute.xlu1 %2356 }
 0x647   : > { %v2359_v33 = vunpack.i.h.bf16 %v2357_v32  ;;  %v2358_v34 = vunpack.i.l.bf16 %v2357_v32  ;;  %v2377_v32 = vld [vmem:[%s2569_s11 + $0x10] sm:$0xff]  }
 0x649   : > { %v1491_v40 = vsel %vm575_vm3, %v1172_v49, %v2359_v33  ;;  %v1490_v29 = vsel %vm575_vm3, %v1124_v48, %v2358_v34  ;;  %v2379_v33 = vld [vmem:[%s2569_s11] sm:$0xff]   ;;  %v1611_v34 = vsub.s32 4, %v2610_v42 }
 0x67a   : > { %v2362_v10 = vpop.permute.xlu0 %2361 }
 0x67b   : > { %v2364_v37 = vunpack.i.h.bf16 %v2362_v10  ;;  %v2363_v59 = vunpack.i.l.bf16 %v2362_v10  ;;  %v2378_v10 = vld [vmem:[%s2569_s11 + $0x8] sm:$0xff]  }
 0x67d   : > { %v1494_v43 = vsel %vm1492_vm5, %v1491_v40, %v2364_v37  ;;  %v1493_v45 = vsel %vm1492_vm5, %v1490_v29, %v2363_v59  ;;  %v1612_v37 = vrot.slane %v2614_v44, %v1611_v34 }
 0x682   : > { %v2367_v60 = vpop.permute.xlu1 %2366 }
 0x683   : > { %v2369_v35 = vunpack.i.h.bf16 %v2367_v60  ;;  %v2368_v41 = vunpack.i.l.bf16 %v2367_v60 }
 0x685   : > { %v1497_v46 = vsel %vm1495_vm6, %v1494_v43, %v2369_v35  ;;  %v1496_v47 = vsel %vm1495_vm6, %v1493_v45, %v2368_v41 }
 0x686   : > { %v1498_v50 = vpack.c.bf16 %v1497_v46, %v1496_v47 }
 0x688   : > { %2270 = vmatmul.mubr.msk.bf16.vlgmr.msra.gmra.mxu1 %vm499_vm2, %v1498_v50 }
 0x689   : > { %2289 = vmatprep.mubr.msk.bf16.mxu1 %vm2467_vm1, %v2466_v36  ;;  %2282 = vmatpush3.bf16.msra.mxu1 %v2376_v31  ;;  %v1799_v31 = vsub.s32 6, %v2610_v42 }
 0x68a   : > { %2283 = vmatprep.subr.bf16.mxu1 %v2466_v36 }
 0x68d   : > { %2284 = vmatpush3.bf16.msra.mxu1 %v2377_v32  ;;  %v1805_v32 = vsub.s32 7, %v2610_v42 }
 0x68e   : > { %2285 = vmatprep.subr.bf16.mxu1 %v2466_v36 }
 0x68f   : > { %v1806_v34 = vrot.slane %v2614_v44, %v1805_v32 }
 0x691   : > { %2286 = vmatpush3.bf16.msra.mxu1 %v2378_v10  ;;  %v1800_v10 = vrot.slane %v2614_v44, %v1799_v31 }
 0x692   : > { %2287 = vmatprep.subr.bf16.mxu1 %v2466_v36 }
 0x695   : > { %2288 = vmatpush3.bf16.msra.mxu1 %v2379_v33 }
 0x748   : > { %v1556_v53 = vpop.f32.mrf.mxu1 }
 0x749   : > { %v1557_v54 = vadd.f32 %v1556_v53, %v1506_v52 }
 0x74a   : > { %v2271_v5 = vpop.f32.mrf.mxu1 }
 0x74b   : > { %v1563_v48 = vadd.f32 %v1557_v54, %v2597_v38 }
 0x74c   : > { %v1559_v49 = vpop.f32.mrf.mxu1 }
 0x74d   : > { %v1560_v55 = vadd.f32 %v1559_v49, %v1506_v52  ;;  %v1565_v56 = vsel %vm499_vm2, %v1563_v48, 0.0 }
 0x74e   : > { %1566 = vadd.xlane.f32.xlu0 %v1565_v56  ;;  %v2272_v57 = vpop.f32.mrf.mxu1 }
 0x74f   : > { %v1564_v58 = vadd.f32 %v1560_v55, %v2599_v39  ;;  %v2375_v39 = vld [vmem:[%s2564_s28] sm:$0xff]  }
 0x750   : > { %2276 = vmatpush3.bf16.msra.mxu0 %v2375_v39 }
 0x751   : > { %v1568_v61 = vsel %vm499_vm2, %v1564_v58, 0.0 }
 0x752   : > { %1569 = vadd.xlane.f32.xlu1 %v1568_v61 }
 0x7d7   : > { %v1567_v63 = vpop.xlane.xlu0 %1566 }
 0x7d8   : > { %v1572_v1 = vmul.f32 0.03125, %v1567_v63 }
 0x7da   : > { %v1574_v2 = vsub.f32 %v1563_v48, %v1572_v1  ;;  %v1698_v1 = vsub.s32 5, %v2610_v42 }
 0x7db   : > { %v1570_v3 = vpop.xlane.xlu1 %1569 }
 0x7dc   : > { %v1573_v6 = vmul.f32 0.03125, %v1570_v3  ;;  %v1576_v7 = vmul.f32 %v1574_v2, %v1574_v2 }
 0x7de   : > { %v1575_v38 = vsub.f32 %v1564_v58, %v1573_v6  ;;  %v1578_v8 = vsel %vm499_vm2, %v1576_v7, 0.0 }
 0x7df   : > { %1579 = vadd.xlane.f32.xlu0 %v1578_v8 }
 0x7e0   : > { %v1577_v11 = vmul.f32 %v1575_v38, %v1575_v38 }
 0x7e2   : > { %v1581_v4 = vsel %vm499_vm2, %v1577_v11, 0.0 }
 0x7e3   : > { %1582 = vadd.xlane.f32.xlu0 %v1581_v4 }
 0x868   : > { %v1580_v9 = vpop.xlane.xlu0 %1579 }
 0x869   : > { %v1584_v12 = vmul.f32 0.03125, %v1580_v9 }
 0x86b   : > { %v1586_v13 = vadd.f32 1e-12, %v1584_v12 }
 0x86c   : > { %v1583_v14 = vpop.xlane.xlu0 %1582 }
 0x86d   : > { %2412 = vrsqrt.f32 %v1586_v13  ;;  %v1585_v15 = vmul.f32 0.03125, %v1583_v14 }
 0x86f   : > { %v1587_v16 = vadd.f32 1e-12, %v1585_v15 }
 0x871   : > { %2414 = vrsqrt.f32 %v1587_v16 }
 0x87a   : > { %v2413_v18 = vpop.eup %2412 }
 0x87b   : > { %v1590_v19 = vmul.f32 %v2413_v18, %v1574_v2  ;;  %v1699_v2 = vrot.slane %v2614_v44, %v1698_v1 }
 0x87d   : > { %v1596_v24 = vmul.f32 %v1595_v20, %v1590_v19 }
 0x87e   : > { %v2415_v22 = vpop.eup %2414 }
 0x87f   : > { %v1591_v23 = vmul.f32 %v2415_v22, %v1575_v38  ;;  %v1602_v27 = vadd.f32 %v1601_v25, %v1596_v24 }
 0x881   : > { %v1597_v26 = vmul.f32 %v1595_v20, %v1591_v23 }
 0x883   : > { %v1603_v28 = vadd.f32 %v1601_v25, %v1597_v26 }
 0x885   : > { %v1604_v30 = vpack.c.bf16 %v1603_v28, %v1602_v27 }
 0x887   : > { %2278 = vmatmul.mubr.msk.bf16.vlgmr.msra.gmra.mxu0 %vm499_vm2, %v1604_v30 }
 0x947   : > { %v1662_v59 = vpop.f32.mrf.mxu0 }
 0x948   : > { %v1663_v60 = vadd.f32 %v1662_v59, %v1612_v37 }
 0x949   : > { %v2279_v40 = vpop.f32.mrf.mxu0 }
 0x94a   : > { %v1671_v29 = vmul.f32 %v1663_v60, %v1663_v60  ;;  %v1669_v55 = vmul.f32 0.5, %v1663_v60 }
 0x94b   : > { %v1665_v35 = vpop.f32.mrf.mxu0 }
 0x94c   : > { %v1673_v41 = vmul.f32 %v1671_v29, %v1663_v60  ;;  %v1666_v43 = vadd.f32 %v1665_v35, %v1612_v37 }
 0x94d   : > { %v2280_v45 = vpop.f32.mrf.mxu0 }
 0x94e   : > { %v1675_v46 = vmul.f32 0.044715, %v1673_v41  ;;  %v1672_v47 = vmul.f32 %v1666_v43, %v1666_v43  ;;  %v1670_v56 = vmul.f32 0.5, %v1666_v43 }
 0x950   : > { %v1677_v50 = vadd.f32 %v1675_v46, %v1663_v60  ;;  %v1674_v51 = vmul.f32 %v1672_v47, %v1666_v43 }
 0x952   : > { %v1679_v52 = vmul.f32 0.7978846, %v1677_v50  ;;  %v1676_v36 = vmul.f32 0.044715, %v1674_v51 }
 0x954   : > { %2416 = vtanh.f32 %v1679_v52  ;;  %v1678_v53 = vadd.f32 %v1676_v36, %v1666_v43 }
 0x956   : > { %v1680_v54 = vmul.f32 0.7978846, %v1678_v53 }
 0x958   : > { %2418 = vtanh.f32 %v1680_v54 }
 0x961   : > { %v2417_v5 = vpop.eup %2416 }
 0x962   : > { %v1683_v48 = vadd.f32 1.0, %v2417_v5 }
 0x964   : > { %v1685_v58 = vmul.f32 %v1683_v48, %v1669_v55 }
 0x965   : > { %v2419_v49 = vpop.eup %2418 }
 0x966   : > { %v1684_v57 = vadd.f32 1.0, %v2419_v49 }
 0x968   : > { %v1686_v61 = vmul.f32 %v1684_v57, %v1670_v56 }
 0x96a   : > { %v1687_v63 = vpack.c.bf16 %v1686_v61, %v1685_v58 }
 0x96c   : > { %2290 = vmatmul.mubr.msk.bf16.vlgmr.msra.gmra.mxu1 %vm1724_vm7, %v1687_v63 }
 0xa2c   : > { %v1762_v3 = vpop.f32.mrf.mxu1 }
 0xa2d   : > { %v1763_v6 = vadd.f32 %v1762_v3, %v1699_v2 }
 0xa2e   : > { %v2291_v7 = vpop.f32.mrf.mxu1 }
 0xa2f   : > { %v1769_v38 = vadd.f32 %v1763_v6, %v1602_v27 }
 0xa30   : > { %v1765_v8 = vpop.f32.mrf.mxu1 }
 0xa31   : > { %v1766_v11 = vadd.f32 %v1765_v8, %v1699_v2  ;;  %v1771_v4 = vsel %vm499_vm2, %v1769_v38, 0.0 }
 0xa32   : > { %1772 = vadd.xlane.f32.xlu1 %v1771_v4  ;;  %v2292_v62 = vpop.f32.mrf.mxu1 }
 0xa33   : > { %v1770_v39 = vadd.f32 %v1766_v11, %v1603_v28 }
 0xa35   : > { %v1774_v9 = vsel %vm499_vm2, %v1770_v39, 0.0 }
 0xa36   : > { %1775 = vadd.xlane.f32.xlu0 %v1774_v9 }
 0xabb   : > { %v1773_v12 = vpop.xlane.xlu1 %1772 }
 0xabc   : > { %v1777_v13 = vmul.f32 0.03125, %v1773_v12 }
 0xabe   : > { %v1779_v14 = vsub.f32 %v1769_v38, %v1777_v13 }
 0xabf   : > { %v1776_v15 = vpop.xlane.xlu0 %1775 }
 0xac0   : > { %v1778_v16 = vmul.f32 0.03125, %v1776_v15  ;;  %v1781_v18 = vmul.f32 %v1779_v14, %v1779_v14 }
 0xac2   : > { %v1780_v19 = vsub.f32 %v1770_v39, %v1778_v16  ;;  %v1783_v20 = vsel %vm499_vm2, %v1781_v18, 0.0 }
 0xac3   : > { %1784 = vadd.xlane.f32.xlu1 %v1783_v20 }
 0xac4   : > { %v1782_v22 = vmul.f32 %v1780_v19, %v1780_v19 }
 0xac6   : > { %v1786_v23 = vsel %vm499_vm2, %v1782_v22, 0.0 }
 0xac7   : > { %1787 = vadd.xlane.f32.xlu0 %v1786_v23 }
 0xb4c   : > { %v1785_v24 = vpop.xlane.xlu1 %1784 }
 0xb4d   : > { %v1789_v25 = vmul.f32 0.03125, %v1785_v24 }
 0xb4f   : > { %v1791_v26 = vadd.f32 1e-12, %v1789_v25 }
 0xb50   : > { %v1788_v27 = vpop.xlane.xlu0 %1787 }
 0xb51   : > { %2420 = vrsqrt.f32 %v1791_v26  ;;  %v1790_v28 = vmul.f32 0.03125, %v1788_v27 }
 0xb53   : > { %v1792_v30 = vadd.f32 1e-12, %v1790_v28 }
 0xb55   : > { %2422 = vrsqrt.f32 %v1792_v30 }
 0xb5e   : > { %v2421_v33 = vpop.eup %2420 }
 0xb5f   : > { %v1795_v37 = vmul.f32 %v2421_v33, %v1779_v14 }
 0xb61   : > { %v1801_v59 = vmul.f32 %v1800_v10, %v1795_v37 }
 0xb62   : > { %v2423_v60 = vpop.eup %2422 }
 0xb63   : > { %v1807_v40 = vadd.f32 %v1806_v34, %v1801_v59  ;;  %v1796_v29 = vmul.f32 %v2423_v60, %v1780_v19 }
 0xb65   : > { %1809 = vst.msk [vmem:[#allocation2] sm:$0xff] %vm499_vm2, %v1807_v40  ;;  %v1802_v35 = vmul.f32 %v1800_v10, %v1796_v29  ;;  %1814 = sbr.rel (%p2094_p5) target bundleno = 3341 (0xd0d), region = 68 }
 0xb67   : > { %v1808_v41 = vadd.f32 %v1806_v34, %v1802_v35 }
 0xb69   : > { %1810 = vst.msk [vmem:[#allocation2 + $0x8] sm:$0xff] %vm499_vm2, %v1808_v41 }
 0xb6a   : > { %v2424_v43 = vld [vmem:[%s2883_s8 + $0x8] sm:$0xff]   ;;  %v1815_v45 = vpack.c.bf16 %v1807_v40, %v1807_v40  ;;  %v1816_v44 = vpack.c.bf16 %v1808_v41, %v1808_v41  ;;  %v2476_v46 = vmov 0.0   ;;  %v2425_v47 = vld [vmem:[%s2883_s8] sm:$0xff]   ;;  %vm2477_vm8 = vmmov 0  }
 0xb6b   : > { %2293 = vmatprep.subr.bf16.mxu0 %v2476_v46  ;;  %2301 = vmatprep.subr.bf16.mxu1 %v2476_v46  ;;  %vm1830_vm9 = vcmask 1041409   ;;  %v2426_v54 = vld [vmem:[%s2884_s9 + $0x8] sm:$0xff]   ;;  %v2427_v5 = vld [vmem:[%s2884_s9] sm:$0xff]   ;;  %v1824_v48 = vrot.slane %v2548_v0, %v1594_v17  ;;  %v1897_v1 = vrot.slane %v2548_v0, %v1600_v21 }
 0xb6c   : > { %2294 = vmatpush3.bf16.msra.mxu0 %v2424_v43  ;;  %2297 = vmatprep.mubr.msk.bf16.mxu0 %vm2477_vm8, %v2476_v46  ;;  %v1827_v50 = vunpack.c.l.b16 %v1815_v45  ;;  %v1828_v51 = vunpack.c.l.b16 %v1816_v44 }
 0xb6d   : > { %2295 = vmatprep.subr.bf16.mxu0 %v2476_v46  ;;  %2305 = vmatprep.mubr.msk.bf16.mxu1 %vm2477_vm8, %v2476_v46 }
 0xb6e   : > { %v1829_v52 = vrot.slane %v1828_v51, 7  ;;  %2302 = vmatpush3.bf16.msra.mxu1 %v2426_v54 }
 0xb6f   : > { %2303 = vmatprep.subr.bf16.mxu1 %v2476_v46 }
 0xb70   : > { %2296 = vmatpush3.bf16.msra.mxu0 %v2425_v47  ;;  %v1831_v36 = vsel %vm1830_vm9, %v1829_v52, %v1827_v50 }
 0xb71   : > { %v1832_v53 = vpack.c.b16 %v1831_v36, %v1831_v36 }
 0xb72   : > { %2304 = vmatpush3.bf16.msra.mxu1 %v2427_v5 }
 0xb73   : > { %2298 = vmatmul.mubr.msk.bf16.vlgmr.msra.gmra.mxu0 %vm499_vm2, %v1832_v53 }
 0xc33   : > { %v1882_v49 = vpop.f32.mrf.mxu0 }
 0xc34   : > { %v1883_v55 = vadd.f32 %v1882_v49, %v1824_v48 }
 0xc35   : > { %v2299_v56 = vpop.f32.mrf.mxu0 }
 0xc36   : > { %2428 = vtanh.f32 %v1883_v55 }
 0xc37   : > { %v1885_v57 = vpop.f32.mrf.mxu0 }
 0xc39   : > { %v2300_v58 = vpop.f32.mrf.mxu0 }
 0xc43   : > { %v2429_v61 = vpop.eup %2428 }
 0xc44   : > { %v1889_v63 = vpack.c.bf16 %v2429_v61, %v2429_v61 }
 0xc46   : > { %2306 = vmatmul.mubr.msk.bf16.vlgmr.msra.gmra.mxu1 %vm499_vm2, %v1889_v63 }
 0xd06   : > { %v1947_v2 = vpop.f32.mrf.mxu1 }
 0xd07   : > { %v1948_v3 = vadd.f32 %v1947_v2, %v1897_v1 }
 0xd08   : > { %v2307_v6 = vpop.f32.mrf.mxu1 }
 0xd09   : > { %1953 = vst [vmem:[#allocation3] sm:$0x3] %v1948_v3 }
 0xd0a   : > { %v1950_v7 = vpop.f32.mrf.mxu1 }
 0xd0c   : > { %v2308_v17 = vpop.f32.mrf.mxu1 }
 0xd0d PF: > { %p2313_p6 = scmp.eq.s32.totalorder %s2540_s14, 1  ;;  %s2478_s22 = smov [#allocation3]  }
 0xd0e   : > { %s1961_s26 = sshll.u32 %s2478_s22, 4  ;;  %s1962_s26 = int_to_ptr.vmem [resolvable:$true] %s1961_s26 }
 0xd0f   : > { %s2430_s27 = scalar_lea.vmem %s1962_s26, 32  ;;  %p2437_p10 = scmp.lt.s32.totalorder %s1962_s26, %s1962_s26 }
 0xd10   : > { %p2431_p7 = scmp.ne.s32.totalorder %s1962_s26, %s2430_s27  ;;  %p2438_p11 = scmp.lt.s32.totalorder %s2430_s27, %s2430_s27 }
 0xd12   : > { %p2432_p8 = pnand %p2431_p7, %p2313_p6  ;;  %p2439_p12 = por %p2438_p11, %p2437_p10 }
 0xd14   : > { %p2433_p9 = pneg %p2432_p8 }
 0xd16   : > { %p2440_p13 = pnand %p2439_p12, %p2433_p9 }
 0xd18   : > { %2443 = shalt.err (!%p2440_p13)
}
 0xd19   : > { %2310 = dma.vmem_to_hbm [thread:$0]  (%p2313_p6), %s1962_s26, 32, %s2885_s10, [#allocation4]  }
 0xd1a   : > { %2459 = dma.done.wait (%p2313_p6), [#allocation4], 32  }
 0xd1b   : > { %2461 = vsyncadd (%p2313_p6), [#allocation4], 4294967264 }
 0xd1c PF: > { %s21_s13 = sadd.s32 1, %s2464_s13  }
 0xd1d   : > { %p18_p0 = scmp.ge.s32.totalorder %s21_s13, 4  }
 0xd1f   :  { %20 = sbr.rel (!%p18_p0) target bundleno = 1 (0x1), region = 107 }
 0xd24   :  { %1974 = vsyncpa [#allocation4], 1 }
 0xd25   :  { %1976 = vsyncpa [#allocation4 + $0x1], 1 }

</bundles_post_ra>
